<compile_context>
chip_gen: v5e
topology: v5e:2x2
jax: 0.10.0
libtpu: 0.0.40
codegen_flags: <defaults>
</compile_context>

<pallas_src>
import functools
import math

import jax
import jax.numpy as jnp
from jax import lax
from jax.experimental import pallas as pl
from jax.experimental.pallas import tpu as pltpu

_MIB = 1024 * 1024


def _round_up(x, m):
    return ((x + m - 1) // m) * m


def _cdiv(a, b):
    return (a + b - 1) // b


def _he_scale(fan_in, equalized, lr_mul):
    # getLayerNormalizationFactor(module) * lrMul
    return (math.sqrt(2.0 / fan_in) * lr_mul) if equalized else 1.0


def _vmem_limit(per_step_bytes):
    # Derived from the actual per-step tile footprint (with margin for
    # relayout temporaries), clamped to [32 MiB default, 60 MiB] so it never
    # exceeds v7x's 64 MiB physical VMEM and never sits below the compiler
    # default on v5e/v6e.
    return int(min(max(4 * per_step_bytes, 32 * _MIB), 60 * _MIB))


# ---------------------------------------------------------------------------
# Conv path: fused 3x3 same-pad conv + bias + he-scale, im2col done in-kernel.
# ---------------------------------------------------------------------------
def _conv3x3_kernel(xm_ref, xh_ref, w_ref, b_ref, o_ref, *, scale):
    """One (batch, row-block, cout-block) step of a 3x3 same-pad conv.

    xm_ref: (1, th, Wp, Cin)  main rows of the zero-padded NHWC input
    xh_ref: (1, 2,  Wp, Cin)  2-row halo directly below the main rows
    w_ref : (9, Cin, tco)     weights, tap-major (dy*3+dx)
    b_ref : (1, tco)          bias (f32)
    o_ref : (1, th, W, tco)   output block
    """
    th, w_out, tco = o_ref.shape[1], o_ref.shape[2], o_ref.shape[3]
    cin = xm_ref.shape[-1]

    # Haloed window for this row block: (th+2, Wp, Cin).
    xwin = jnp.concatenate([xm_ref[0], xh_ref[0]], axis=0)

    # Fused in-kernel im2col: 9 shifted taps accumulated in f32 on the MXU.
    acc = jnp.zeros((th * w_out, tco), jnp.float32)
    for dy in range(3):
        for dx in range(3):
            patch = xwin[dy:dy + th, dx:dx + w_out, :].reshape(th * w_out, cin)
            acc = acc + jnp.dot(patch, w_ref[dy * 3 + dx],
                                preferred_element_type=jnp.float32)

    out = (acc + b_ref[...]) * scale          # bias + equalized-LR scale
    o_ref[0] = out.reshape(th, w_out, tco).astype(o_ref.dtype)


def _pick_th(h, wp, w, cin, tco, out_itemsize, th_max=64, budget=16 * _MIB):
    """Largest even divisor of H whose per-step tiles fit the VMEM budget."""
    best = 2
    for t in range(2, min(h, th_max) + 1, 2):
        if h % t:
            continue
        per_step = (2 * (t + 2) * wp * cin * 2          # act rows (bf16, 2-buf)
                    + 2 * 9 * cin * tco * 2             # weights (2-buf)
                    + 2 * t * w * tco * out_itemsize    # out block (2-buf)
                    + 6 * t * w * tco * 4)              # f32 acc + temps
        if per_step <= budget:
            best = t
    return best


def constrained_conv2d_nhwc(x_nhwc, w_oihw, bias, *, equalized=True,
                            lr_mul=1.0, compute_dtype=jnp.bfloat16,
                            out_dtype=jnp.float32):
    """ConstrainedLayer(nn.Conv2d(Cin, Cout, 3, padding=1)), NHWC activations.

    x_nhwc: (N, H, W, Cin), w_oihw: (Cout, Cin, 3, 3) (PyTorch layout),
    bias: (Cout,).  Returns (N, H, W, Cout) in out_dtype.

    Keep activations NHWC end to end; use constrained_conv2d_nchw only when a
    PyTorch-layout drop-in is required (each transpose is an extra HBM pass).
    Set compute_dtype=jnp.float32 for exact parity with the f32 PyTorch math.
    """
    n, h, w, cin = x_nhwc.shape
    cout, cin_w, kh, kw = w_oihw.shape
    assert (kh, kw) == (3, 3) and cin_w == cin
    if h % 2:
        # TODO(synk): odd H needs a different halo blocking (the 2-row halo
        # blocks assume even row offsets); unused here (power-of-two images).
        raise NotImplementedError("constrained_conv2d_nhwc requires even H")

    scale = _he_scale(cin * kh * kw, equalized, lr_mul)

    # Single fused pad+cast pass over the activations — the only wrapper-side
    # HBM pass (the 9x im2col happens inside the kernel).
    xp = jnp.pad(x_nhwc, ((0, 0), (1, 1), (1, 1), (0, 0))).astype(compute_dtype)
    hp, wp = h + 2, w + 2

    # Weights: (Cout, Cin, 3, 3) -> (9, Cin, Cout), tap-major (dy*3+dx).
    w9 = jnp.transpose(w_oihw, (2, 3, 1, 0)).reshape(9, cin, cout)
    w9 = w9.astype(compute_dtype)
    b2 = bias.reshape(1, cout).astype(jnp.float32)

    # Cout tiling: full Cout when small, 256-wide tiles otherwise (feeds the
    # 256-wide MXU on v6e/v7x; also fine on v5e).
    tco = cout if cout <= 256 else 256
    nc = _cdiv(cout, tco)

    out_itemsize = jnp.dtype(out_dtype).itemsize
    act_itemsize = jnp.dtype(compute_dtype).itemsize

    th = _pick_th(h, wp, w, cin, tco, out_itemsize)
    # Keep >= 2 grid steps when possible so both of v7x's TensorCores get work
    # and the pipeline has steps to overlap.
    if n * (h // th) * nc == 1:
        for t in range(th - 2, 0, -2):
            if h % t == 0:
                th = t
                break
    nr = h // th
    half_th = th // 2

    grid = (n, nr, nc)

    in_specs = [
        # Main th padded rows for this row block.
        pl.BlockSpec((1, th, wp, cin), lambda b, r, c: (b, r, 0, 0)),
        # 2-row halo directly below (same padded array, 2-row blocking).
        pl.BlockSpec((1, 2, wp, cin),
                     lambda b, r, c: (b, (r + 1) * half_th, 0, 0)),
        # Grid-invariant weights / bias.
        # TODO(synk): for very large Cin*Cout weights, single-buffer these
        # (pipeline_mode=pl.Buffered(1)) to reclaim VMEM on v7x (64 MiB).
        pl.BlockSpec((9, cin, tco), lambda b, r, c: (0, 0, c)),
        pl.BlockSpec((1, tco), lambda b, r, c: (0, c)),
    ]
    out_spec = pl.BlockSpec((1, th, w, tco), lambda b, r, c: (b, r, 0, c))

    per_step = (2 * (th + 2) * wp * cin * act_itemsize
                + 2 * 9 * cin * tco * act_itemsize + 2 * tco * 4
                + 2 * th * w * tco * out_itemsize
                + 6 * th * w * tco * 4)
    cost = pl.CostEstimate(
        flops=2 * n * h * w * 9 * cin * cout,
        transcendentals=0,
        bytes_accessed=(n * hp * wp * cin * act_itemsize * (th + 2) // th
                        + n * nr * nc * 9 * cin * tco * act_itemsize
                        + n * h * w * cout * out_itemsize),
    )

    return pl.pallas_call(
        functools.partial(_conv3x3_kernel, scale=scale),
        out_shape=jax.ShapeDtypeStruct((n, h, w, cout), out_dtype),
        grid_spec=pltpu.PrefetchScalarGridSpec(
            num_scalar_prefetch=0,
            grid=grid,
            in_specs=in_specs,
            out_specs=out_spec,
        ),
        compiler_params=pltpu.CompilerParams(
            # Every grid step writes its own output block -> fully parallel
            # (shards across v7x's two TensorCores).
            dimension_semantics=("parallel", "parallel", "parallel"),
            vmem_limit_bytes=_vmem_limit(per_step),
        ),
        cost_estimate=cost,
    )(xp, xp, w9, b2)


def constrained_conv2d_nchw(x_nchw, w_oihw, bias, **kw):
    """PyTorch-layout (NCHW) drop-in.  Prefer the NHWC entry point: each
    transpose here is a full extra HBM pass that XLA cannot fuse into the
    Pallas call."""
    y = constrained_conv2d_nhwc(jnp.transpose(x_nchw, (0, 2, 3, 1)),
                                w_oihw, bias, **kw)
    return jnp.transpose(y, (0, 3, 1, 2))


# ---------------------------------------------------------------------------
# Linear path: fused  out = (A @ B + bias) * he_scale
# ---------------------------------------------------------------------------
def _matmul_bias_scale_kernel(a_ref, b_ref, bias_ref, o_ref, *, scale):
    acc = jnp.dot(a_ref[...], b_ref[...], preferred_element_type=jnp.float32)
    o_ref[...] = ((acc + bias_ref[...]) * scale).astype(o_ref.dtype)


def _pick_tm(m, tm_max=512):
    """Row-tile size: multiple of 16 (bf16 sublane packing), aiming for an
    EVEN number of row tiles so v7x's two TensorCores both get work."""
    if m <= 16:
        return _round_up(m, 8)
    n_tiles = 2 * _cdiv(_cdiv(m, tm_max), 2)
    return min(_round_up(_cdiv(m, n_tiles), 16), tm_max)


def constrained_linear(x, w_oi, bias, *, equalized=True, lr_mul=1.0,
                       compute_dtype=jnp.bfloat16, out_dtype=jnp.float32):
    """ConstrainedLayer(nn.Linear(in, out)):  y = (x @ W.T + b) * he_scale.

    x: (B, in), w_oi: (out, in) (PyTorch layout), bias: (out,).
    """
    out_f, in_f = w_oi.shape
    m = x.shape[0]
    scale = _he_scale(in_f, equalized, lr_mul)

    # NOTE: a standalone cast is one pass over the activations; if profiling
    # shows it exposed, CompilerParams(allow_input_fusion=[0]) lets XLA fuse
    # the producer into the pallas_call operand.
    a = x.astype(compute_dtype)
    b = jnp.transpose(w_oi).astype(compute_dtype)          # (in, out)

    # Pad K to a sublane multiple so the MXU contraction is unmasked; zero
    # columns contribute nothing.
    k = in_f
    k_pad = (-k) % 16
    if k_pad:
        a = jnp.pad(a, ((0, 0), (0, k_pad)))
        b = jnp.pad(b, ((0, k_pad), (0, 0)))
        k += k_pad
    b2 = bias.reshape(1, out_f).astype(jnp.float32)

    tm = _pick_tm(m)
    tn = out_f if out_f <= 256 else 256       # 256-wide tiles for v6e/v7x MXU
    grid = (_cdiv(m, tm), _cdiv(out_f, tn))   # ragged tails handled by grid

    act_itemsize = jnp.dtype(compute_dtype).itemsize
    out_itemsize = jnp.dtype(out_dtype).itemsize
    per_step = (2 * tm * k * act_itemsize + 2 * k * tn * act_itemsize
                + 2 * tn * 4 + 2 * tm * tn * out_itemsize + 4 * tm * tn * 4)
    cost = pl.CostEstimate(
        flops=2 * m * k * out_f, transcendentals=0,
        bytes_accessed=(m * k * act_itemsize + k * out_f * act_itemsize
                        + out_f * 4 + m * out_f * out_itemsize))

    return pl.pallas_call(
        functools.partial(_matmul_bias_scale_kernel, scale=scale),
        out_shape=jax.ShapeDtypeStruct((m, out_f), out_dtype),
        grid_spec=pltpu.PrefetchScalarGridSpec(
            num_scalar_prefetch=0,
            grid=grid,
            in_specs=[
                pl.BlockSpec((tm, k), lambda i, j: (i, 0)),
                pl.BlockSpec((k, tn), lambda i, j: (0, j)),
                pl.BlockSpec((1, tn), lambda i, j: (0, j)),
            ],
            out_specs=pl.BlockSpec((tm, tn), lambda i, j: (i, j)),
        ),
        compiler_params=pltpu.CompilerParams(
            dimension_semantics=("parallel", "parallel"),
            vmem_limit_bytes=_vmem_limit(per_step),
        ),
        cost_estimate=cost,
    )(a, b, b2)


# ---------------------------------------------------------------------------
# Parameter init mirroring ConstrainedLayer.__init__
#   (initBiasToZero -> bias = 0, equalized -> weight ~ N(0,1) / lrMul)
# ---------------------------------------------------------------------------
def init_constrained_conv2d(key, cin, cout, *, lr_mul=1.0):
    w = jax.random.normal(key, (cout, cin, 3, 3), jnp.float32) / lr_mul
    b = jnp.zeros((cout,), jnp.float32)
    return w, b


def init_constrained_linear(key, in_f, out_f, *, lr_mul=1.0):
    w = jax.random.normal(key, (out_f, in_f), jnp.float32) / lr_mul
    b = jnp.zeros((out_f,), jnp.float32)
    return w, b


if __name__ == "__main__":
    key = jax.random.PRNGKey(0)
    k_wc, k_xc, k_wl, k_xl = jax.random.split(key, 4)

    # --- ConstrainedLayer(nn.Conv2d(4, 128, 3, padding=1)), NHWC activations
    cin, cout, hh, ww, nb = 4, 128, 16, 16, 2
    w_conv, b_conv = init_constrained_conv2d(k_wc, cin, cout, lr_mul=1.0)
    x_conv = jax.random.normal(k_xc, (nb, hh, ww, cin), jnp.float32)

    conv_fn = jax.jit(functools.partial(
        constrained_conv2d_nhwc, equalized=True, lr_mul=1.0))
    y_conv = jax.block_until_ready(conv_fn(x_conv, w_conv, b_conv))
    assert y_conv.shape == (nb, hh, ww, cout)

    scale_c = math.sqrt(2.0 / (cin * 9))
    ref_conv = lax.conv_general_dilated(
        x_conv, jnp.transpose(w_conv, (2, 3, 1, 0)), (1, 1), "SAME",
        dimension_numbers=("NHWC", "HWIO", "NHWC"))
    ref_conv = (ref_conv + b_conv) * scale_c
    err_c = float(jnp.max(jnp.abs(y_conv - ref_conv)))
    assert err_c < 1e-1, f"conv mismatch: max|diff|={err_c}"

    # --- ConstrainedLayer(nn.Linear(32, 128))
    in_f, out_f, bsz = 32, 128, 8
    w_lin, b_lin = init_constrained_linear(k_wl, in_f, out_f, lr_mul=1.0)
    x_lin = jax.random.normal(k_xl, (bsz, in_f), jnp.float32)

    lin_fn = jax.jit(functools.partial(
        constrained_linear, equalized=True, lr_mul=1.0))
    y_lin = jax.block_until_ready(lin_fn(x_lin, w_lin, b_lin))
    assert y_lin.shape == (bsz, out_f)

    ref_lin = (x_lin @ w_lin.T + b_lin) * math.sqrt(2.0 / in_f)
    err_l = float(jnp.max(jnp.abs(y_lin - ref_lin)))
    assert err_l < 1e-1, f"linear mismatch: max|diff|={err_l}"

    print("KERNEL_OK")
</pallas_src>

<mosaic_0001>
module attributes {stable_mosaic.version = 11 : i64} {
  func.func @_conv3x3_kernel(%arg0: i32, %arg1: i32, %arg2: i32, %arg3: memref<1x16x18x4xbf16, #tpu.memory_space<vmem>>, %arg4: memref<1x2x18x4xbf16, #tpu.memory_space<vmem>>, %arg5: memref<9x4x128xbf16, #tpu.memory_space<vmem>>, %arg6: memref<1x128xf32, #tpu.memory_space<vmem>>, %arg7: memref<1x16x16x128xf32, #tpu.memory_space<vmem>>) attributes {dimension_semantics = [#tpu.dimension_semantics<parallel>, #tpu.dimension_semantics<parallel>, #tpu.dimension_semantics<parallel>], iteration_bounds = array<i64: 2, 1, 1>, scalar_prefetch = 0 : i64, scratch_operands = 0 : i64, tpu.core_type = #tpu.core_type<tc>, window_params = [{transform_indices = @transform_0, window_bounds = array<i64: 1, 16, 18, 4>}, {transform_indices = @transform_1, window_bounds = array<i64: 1, 2, 18, 4>}, {transform_indices = @transform_2, window_bounds = array<i64: 9, 4, 128>}, {transform_indices = @transform_3, window_bounds = array<i64: 1, 128>}, {transform_indices = @transform_4, window_bounds = array<i64: 1, 16, 16, 128>}]} {
    %c0 = arith.constant 0 : index
    %c0_0 = arith.constant 0 : index
    %c0_1 = arith.constant 0 : index
    %c0_2 = arith.constant 0 : index
    %0 = vector.load %arg3[%c0, %c0_0, %c0_1, %c0_2] : memref<1x16x18x4xbf16, #tpu.memory_space<vmem>>, vector<1x16x18x4xbf16>
    %1 = vector.shape_cast %0 : vector<1x16x18x4xbf16> to vector<16x18x4xbf16>
    %c0_3 = arith.constant 0 : index
    %c0_4 = arith.constant 0 : index
    %c0_5 = arith.constant 0 : index
    %c0_6 = arith.constant 0 : index
    %2 = vector.load %arg4[%c0_3, %c0_4, %c0_5, %c0_6] : memref<1x2x18x4xbf16, #tpu.memory_space<vmem>>, vector<1x2x18x4xbf16>
    %3 = vector.shape_cast %2 : vector<1x2x18x4xbf16> to vector<2x18x4xbf16>
    %4 = tpu.concatenate %1, %3 in 0 : vector<16x18x4xbf16>, vector<2x18x4xbf16> -> vector<18x18x4xbf16>
    %cst = arith.constant 0.000000e+00 : f32
    %5 = vector.broadcast %cst : f32 to vector<256x128xf32>
    %6 = vector.extract_strided_slice %4 {offsets = [0, 0, 0], sizes = [16, 16, 4], strides = [1, 1, 1]} : vector<18x18x4xbf16> to vector<16x16x4xbf16>
    %7 = vector.shape_cast %6 : vector<16x16x4xbf16> to vector<256x4xbf16>
    %c0_7 = arith.constant 0 : index
    %c0_8 = arith.constant 0 : index
    %c0_9 = arith.constant 0 : index
    %8 = vector.load %arg5[%c0_7, %c0_8, %c0_9] : memref<9x4x128xbf16, #tpu.memory_space<vmem>>, vector<1x4x128xbf16>
    %9 = vector.shape_cast %8 : vector<1x4x128xbf16> to vector<4x128xbf16>
    %cst_10 = arith.constant dense<0.000000e+00> : vector<256x128xf32>
    %10 = tpu.matmul %7, %9, %cst_10 {dimension_numbers = #tpu.dot_dimension_numbers<[1], [0], [0], [1], [0, 0, 1, 1], [], []>} : vector<256x4xbf16>, vector<4x128xbf16>, vector<256x128xf32> -> vector<256x128xf32>
    %11 = arith.addf %5, %10 : vector<256x128xf32>
    %12 = vector.extract_strided_slice %4 {offsets = [0, 1, 0], sizes = [16, 16, 4], strides = [1, 1, 1]} : vector<18x18x4xbf16> to vector<16x16x4xbf16>
    %13 = vector.shape_cast %12 : vector<16x16x4xbf16> to vector<256x4xbf16>
    %c1 = arith.constant 1 : index
    %c0_11 = arith.constant 0 : index
    %c0_12 = arith.constant 0 : index
    %14 = vector.load %arg5[%c1, %c0_11, %c0_12] : memref<9x4x128xbf16, #tpu.memory_space<vmem>>, vector<1x4x128xbf16>
    %15 = vector.shape_cast %14 : vector<1x4x128xbf16> to vector<4x128xbf16>
    %cst_13 = arith.constant dense<0.000000e+00> : vector<256x128xf32>
    %16 = tpu.matmul %13, %15, %cst_13 {dimension_numbers = #tpu.dot_dimension_numbers<[1], [0], [0], [1], [0, 0, 1, 1], [], []>} : vector<256x4xbf16>, vector<4x128xbf16>, vector<256x128xf32> -> vector<256x128xf32>
    %17 = arith.addf %11, %16 : vector<256x128xf32>
    %18 = vector.extract_strided_slice %4 {offsets = [0, 2, 0], sizes = [16, 16, 4], strides = [1, 1, 1]} : vector<18x18x4xbf16> to vector<16x16x4xbf16>
    %19 = vector.shape_cast %18 : vector<16x16x4xbf16> to vector<256x4xbf16>
    %c2 = arith.constant 2 : index
    %c0_14 = arith.constant 0 : index
    %c0_15 = arith.constant 0 : index
    %20 = vector.load %arg5[%c2, %c0_14, %c0_15] : memref<9x4x128xbf16, #tpu.memory_space<vmem>>, vector<1x4x128xbf16>
    %21 = vector.shape_cast %20 : vector<1x4x128xbf16> to vector<4x128xbf16>
    %cst_16 = arith.constant dense<0.000000e+00> : vector<256x128xf32>
    %22 = tpu.matmul %19, %21, %cst_16 {dimension_numbers = #tpu.dot_dimension_numbers<[1], [0], [0], [1], [0, 0, 1, 1], [], []>} : vector<256x4xbf16>, vector<4x128xbf16>, vector<256x128xf32> -> vector<256x128xf32>
    %23 = arith.addf %17, %22 : vector<256x128xf32>
    %24 = vector.extract_strided_slice %4 {offsets = [1, 0, 0], sizes = [16, 16, 4], strides = [1, 1, 1]} : vector<18x18x4xbf16> to vector<16x16x4xbf16>
    %25 = vector.shape_cast %24 : vector<16x16x4xbf16> to vector<256x4xbf16>
    %c3 = arith.constant 3 : index
    %c0_17 = arith.constant 0 : index
    %c0_18 = arith.constant 0 : index
    %26 = vector.load %arg5[%c3, %c0_17, %c0_18] : memref<9x4x128xbf16, #tpu.memory_space<vmem>>, vector<1x4x128xbf16>
    %27 = vector.shape_cast %26 : vector<1x4x128xbf16> to vector<4x128xbf16>
    %cst_19 = arith.constant dense<0.000000e+00> : vector<256x128xf32>
    %28 = tpu.matmul %25, %27, %cst_19 {dimension_numbers = #tpu.dot_dimension_numbers<[1], [0], [0], [1], [0, 0, 1, 1], [], []>} : vector<256x4xbf16>, vector<4x128xbf16>, vector<256x128xf32> -> vector<256x128xf32>
    %29 = arith.addf %23, %28 : vector<256x128xf32>
    %30 = vector.extract_strided_slice %4 {offsets = [1, 1, 0], sizes = [16, 16, 4], strides = [1, 1, 1]} : vector<18x18x4xbf16> to vector<16x16x4xbf16>
    %31 = vector.shape_cast %30 : vector<16x16x4xbf16> to vector<256x4xbf16>
    %c4 = arith.constant 4 : index
    %c0_20 = arith.constant 0 : index
    %c0_21 = arith.constant 0 : index
    %32 = vector.load %arg5[%c4, %c0_20, %c0_21] : memref<9x4x128xbf16, #tpu.memory_space<vmem>>, vector<1x4x128xbf16>
    %33 = vector.shape_cast %32 : vector<1x4x128xbf16> to vector<4x128xbf16>
    %cst_22 = arith.constant dense<0.000000e+00> : vector<256x128xf32>
    %34 = tpu.matmul %31, %33, %cst_22 {dimension_numbers = #tpu.dot_dimension_numbers<[1], [0], [0], [1], [0, 0, 1, 1], [], []>} : vector<256x4xbf16>, vector<4x128xbf16>, vector<256x128xf32> -> vector<256x128xf32>
    %35 = arith.addf %29, %34 : vector<256x128xf32>
    %36 = vector.extract_strided_slice %4 {offsets = [1, 2, 0], sizes = [16, 16, 4], strides = [1, 1, 1]} : vector<18x18x4xbf16> to vector<16x16x4xbf16>
    %37 = vector.shape_cast %36 : vector<16x16x4xbf16> to vector<256x4xbf16>
    %c5 = arith.constant 5 : index
    %c0_23 = arith.constant 0 : index
    %c0_24 = arith.constant 0 : index
    %38 = vector.load %arg5[%c5, %c0_23, %c0_24] : memref<9x4x128xbf16, #tpu.memory_space<vmem>>, vector<1x4x128xbf16>
    %39 = vector.shape_cast %38 : vector<1x4x128xbf16> to vector<4x128xbf16>
    %cst_25 = arith.constant dense<0.000000e+00> : vector<256x128xf32>
    %40 = tpu.matmul %37, %39, %cst_25 {dimension_numbers = #tpu.dot_dimension_numbers<[1], [0], [0], [1], [0, 0, 1, 1], [], []>} : vector<256x4xbf16>, vector<4x128xbf16>, vector<256x128xf32> -> vector<256x128xf32>
    %41 = arith.addf %35, %40 : vector<256x128xf32>
    %42 = vector.extract_strided_slice %4 {offsets = [2, 0, 0], sizes = [16, 16, 4], strides = [1, 1, 1]} : vector<18x18x4xbf16> to vector<16x16x4xbf16>
    %43 = vector.shape_cast %42 : vector<16x16x4xbf16> to vector<256x4xbf16>
    %c6 = arith.constant 6 : index
    %c0_26 = arith.constant 0 : index
    %c0_27 = arith.constant 0 : index
    %44 = vector.load %arg5[%c6, %c0_26, %c0_27] : memref<9x4x128xbf16, #tpu.memory_space<vmem>>, vector<1x4x128xbf16>
    %45 = vector.shape_cast %44 : vector<1x4x128xbf16> to vector<4x128xbf16>
    %cst_28 = arith.constant dense<0.000000e+00> : vector<256x128xf32>
    %46 = tpu.matmul %43, %45, %cst_28 {dimension_numbers = #tpu.dot_dimension_numbers<[1], [0], [0], [1], [0, 0, 1, 1], [], []>} : vector<256x4xbf16>, vector<4x128xbf16>, vector<256x128xf32> -> vector<256x128xf32>
    %47 = arith.addf %41, %46 : vector<256x128xf32>
    %48 = vector.extract_strided_slice %4 {offsets = [2, 1, 0], sizes = [16, 16, 4], strides = [1, 1, 1]} : vector<18x18x4xbf16> to vector<16x16x4xbf16>
    %49 = vector.shape_cast %48 : vector<16x16x4xbf16> to vector<256x4xbf16>
    %c7 = arith.constant 7 : index
    %c0_29 = arith.constant 0 : index
    %c0_30 = arith.constant 0 : index
    %50 = vector.load %arg5[%c7, %c0_29, %c0_30] : memref<9x4x128xbf16, #tpu.memory_space<vmem>>, vector<1x4x128xbf16>
    %51 = vector.shape_cast %50 : vector<1x4x128xbf16> to vector<4x128xbf16>
    %cst_31 = arith.constant dense<0.000000e+00> : vector<256x128xf32>
    %52 = tpu.matmul %49, %51, %cst_31 {dimension_numbers = #tpu.dot_dimension_numbers<[1], [0], [0], [1], [0, 0, 1, 1], [], []>} : vector<256x4xbf16>, vector<4x128xbf16>, vector<256x128xf32> -> vector<256x128xf32>
    %53 = arith.addf %47, %52 : vector<256x128xf32>
    %54 = vector.extract_strided_slice %4 {offsets = [2, 2, 0], sizes = [16, 16, 4], strides = [1, 1, 1]} : vector<18x18x4xbf16> to vector<16x16x4xbf16>
    %55 = vector.shape_cast %54 : vector<16x16x4xbf16> to vector<256x4xbf16>
    %c8 = arith.constant 8 : index
    %c0_32 = arith.constant 0 : index
    %c0_33 = arith.constant 0 : index
    %56 = vector.load %arg5[%c8, %c0_32, %c0_33] : memref<9x4x128xbf16, #tpu.memory_space<vmem>>, vector<1x4x128xbf16>
    %57 = vector.shape_cast %56 : vector<1x4x128xbf16> to vector<4x128xbf16>
    %cst_34 = arith.constant dense<0.000000e+00> : vector<256x128xf32>
    %58 = tpu.matmul %55, %57, %cst_34 {dimension_numbers = #tpu.dot_dimension_numbers<[1], [0], [0], [1], [0, 0, 1, 1], [], []>} : vector<256x4xbf16>, vector<4x128xbf16>, vector<256x128xf32> -> vector<256x128xf32>
    %59 = arith.addf %53, %58 : vector<256x128xf32>
    %c0_35 = arith.constant 0 : index
    %c0_36 = arith.constant 0 : index
    %60 = vector.load %arg6[%c0_35, %c0_36] : memref<1x128xf32, #tpu.memory_space<vmem>>, vector<1x128xf32>
    %61 = vector.broadcast %60 : vector<1x128xf32> to vector<256x128xf32>
    %62 = arith.addf %59, %61 : vector<256x128xf32>
    %cst_37 = arith.constant 0.235702261 : f32
    %63 = vector.broadcast %cst_37 : f32 to vector<256x128xf32>
    %64 = arith.mulf %62, %63 : vector<256x128xf32>
    %65 = vector.shape_cast %64 : vector<256x128xf32> to vector<16x16x128xf32>
    %c0_38 = arith.constant 0 : index
    %c0_39 = arith.constant 0 : index
    %c0_40 = arith.constant 0 : index
    %c0_41 = arith.constant 0 : index
    %66 = vector.load %arg7[%c0_38, %c0_39, %c0_40, %c0_41] : memref<1x16x16x128xf32, #tpu.memory_space<vmem>>, vector<1x16x16x128xf32>
    %67 = vector.shape_cast %66 : vector<1x16x16x128xf32> to vector<16x16x128xf32>
    %68 = vector.shape_cast %65 : vector<16x16x128xf32> to vector<1x16x16x128xf32>
    tpu.vector_store %arg7[%c0_38, %c0_39, %c0_40, %c0_41], %68 {strides = array<i32>} : memref<1x16x16x128xf32, #tpu.memory_space<vmem>>, vector<1x16x16x128xf32>,
    return
  }
  func.func @transform_0(%arg0: i32, %arg1: i32, %arg2: i32) -> (i32, i32, i32, i32) {
    %c0_i32 = arith.constant 0 : i32
    %c0_i32_0 = arith.constant 0 : i32
    %c0_i32_1 = arith.constant 0 : i32
    return %arg0, %arg1, %c0_i32, %c0_i32_0 : i32, i32, i32, i32
  }
  func.func @transform_1(%arg0: i32, %arg1: i32, %arg2: i32) -> (i32, i32, i32, i32) {
    %c1_i32 = arith.constant 1 : i32
    %0 = arith.addi %arg1, %c1_i32 : i32
    %c8_i32 = arith.constant 8 : i32
    %1 = arith.muli %0, %c8_i32 : i32
    %c0_i32 = arith.constant 0 : i32
    %c0_i32_0 = arith.constant 0 : i32
    %c0_i32_1 = arith.constant 0 : i32
    return %arg0, %1, %c0_i32, %c0_i32_0 : i32, i32, i32, i32
  }
  func.func @transform_2(%arg0: i32, %arg1: i32, %arg2: i32) -> (i32, i32, i32) {
    %c0_i32 = arith.constant 0 : i32
    %c0_i32_0 = arith.constant 0 : i32
    %c0_i32_1 = arith.constant 0 : i32
    return %c0_i32, %c0_i32_0, %arg2 : i32, i32, i32
  }
  func.func @transform_3(%arg0: i32, %arg1: i32, %arg2: i32) -> (i32, i32) {
    %c0_i32 = arith.constant 0 : i32
    %c0_i32_0 = arith.constant 0 : i32
    return %c0_i32, %arg2 : i32, i32
  }
  func.func @transform_4(%arg0: i32, %arg1: i32, %arg2: i32) -> (i32, i32, i32, i32) {
    %c0_i32 = arith.constant 0 : i32
    %c0_i32_0 = arith.constant 0 : i32
    return %arg0, %arg1, %c0_i32, %arg2 : i32, i32, i32, i32
  }
}

</mosaic_0001>

<bundles_post_ra>
// kernel: constrained_conv2d_nhwc.1
= control target key start
LH: loop header
LB: loop body
LE: loop exit
PB: predicated region body
PF: predicated region fallthrough
CT: control target
= control target key end

     0   :  { %9 = vsyncpa [#allocation3], 0  ;;  %s4357_s0 = inlined_call_operand.vmem [shape: bf16[2,18,18,4], index: 0, kind: input, shape index: {}, may-alias: {0,1}]   ;;  %s4358_s1 = inlined_call_operand.vmem [shape: bf16[2,18,18,4], index: 1, kind: input, shape index: {}, may-alias: {0,1}]   ;;  %s4359_s2 = inlined_call_operand.vmem [shape: bf16[9,4,128], index: 2, kind: input, shape index: {}]   ;;  %s4360_s3 = inlined_call_operand.vmem [shape: f32[1,128], index: 3, kind: input, shape index: {}]   ;;  %s4361_s4 = inlined_call_operand.hbm [shape: f32[2,16,16,128], index: 4, kind: output, shape index: {}]  }
   0x1   :  { %11 = vsyncpa [#allocation3 + $0x1], 0  ;;  %s3127_s15 = smov 0   ;;  %s3129_s16 = smov 0  }
   0x2   :  { %s3131_s17 = smov 0   ;;  %s3133_s18 = smov 0  }
   0x3   :  { %s3135_s19 = smov 0   ;;  %s3137_s20 = smov 0  }
   0x4 LB: > { %s2670_s21 = sadd.s32 4294967295, %s3098_s20   ;;  %s2671_s22 = sadd.s32 4294967294, %s3098_s20   ;;  %s3098_s20 = sphi %s3137_s20, %s17_s20   ;;  %s3094_s19 = sphi %s3135_s19, %s4506_s19   ;;  %s3090_s18 = sphi %s3133_s18, %s4505_s18   ;;  %s3086_s17 = sphi %s3131_s17, %s4504_s17   ;;  %s3082_s16 = sphi %s3129_s16, %s4503_s16   ;;  %s3078_s15 = sphi %s3127_s15, %s4502_s15  }
   0x5   : > { %s36_s23 = sadd.s32 1, %s3094_s19  ;;  %s159_s24 = sadd.s32 1, %s3086_s17 }
   0x6   : > { %p38_p0 = scmp.ge.s32.totalorder %s36_s23, 2  ;;  %p169_p1 = scmp.ne.s32.totalorder %s3086_s17, %s3082_s16 }
   0x7   : > { %p170_p2 = scmp.eq.s32.totalorder %s2670_s21, 1  ;;  %p175_p3 = scmp.ne.s32.totalorder %s3082_s16, %s3078_s15 }
   0x8   : > { %s4508_s23 = smov (%p38_p0, %s36_s23), 0  ;;  %p176_p5 = scmp.eq.s32.totalorder %s2671_s22, 1 }
   0x9   : > { %p3167_p4 = por %p170_p2, %p169_p1  ;;  %s152_s26 = ssub.s32 %s3094_s19, %s4508_s23 }
   0xa   : > { %p2676_p6 = scmp.ge.s32.totalorder %s3098_s20, 1  ;;  %p157_p7 = scmp.eq.s32.totalorder %s152_s26, 0 }
   0xb   : > { %p3174_p8 = por %p176_p5, %p175_p3  ;;  %p249_p9 = scmp.lt.s32.totalorder %s3098_s20, 3 }
   0xc   : > { %s3180_s28 = scalar_select %p157_p7, %s3086_s17, %s159_s24  }
   0xd   : > { %p250_p10 = pnand %p2676_p6, %p249_p9 }
   0xf   : > { %253 = sbr.rel (%p250_p10) target bundleno = 771 (0x303), region = 36 }
  0x14   : > { %v2680_v0 = vld [vmem:[%s4359_s2 + $0x2] sm:$0x3]  ;;  %vm890_vm0 = vcmask 1041408   ;;  %p310_p11 = scmp.lt.s32.totalorder %s3090_s18, 1  ;;  %v2793_v2 = vld [vmem:[%s4359_s2 + $0x4] sm:$0x3] }
  0x15   : > { %v892_v1 = vsel %vm890_vm0, %v2680_v0, 0  ;;  %v1433_v3 = vsel %vm890_vm0, %v2793_v2, 0  ;;  %v2810_v4 = vld [vmem:[%s4359_s2 + $0x6] sm:$0x3]  ;;  %v403_v5 = vld [vmem:[%s4359_s2] sm:$0x3] }
  0x16   : > { %2948 = vmatpush.bf16.msra.mxu1 %v892_v1  ;;  %2949 = vmatpush.bf16.msra.mxu2 %v892_v1  ;;  %s3191_s7 = scalar_select %p310_p11, %s3090_s18, 1  ;;  %v2831_v6 = vld [vmem:[%s4359_s2 + $0x8] sm:$0x3]  ;;  %v1567_v7 = vsel %vm890_vm0, %v2810_v4, 0  ;;  %v1112_v8 = vsel %vm890_vm0, %v403_v5, 0  ;;  %vm841_vm4 = vcmask 31744  }
  0x17   : > { %2950 = vmatpush.bf16.msra.mxu3 %v892_v1  ;;  %901 = vmatpush.bf16.msra.mxu0 %v892_v1  ;;  %v1723_v9 = vsel %vm890_vm0, %v2831_v6, 0  ;;  %vm404_vm1 = vsmask.f32 3328  ;;  %vm405_vm2 = vsmask.f32 7440  ;;  %vm1219_vm5 = vcmask 1042432  }
  0x18   : > { %s2951_s14 = smul.u32 216, %s3191_s7  ;;  %vm3239_vm3 = vmor %vm404_vm1, %vm405_vm2  ;;  %vm1220_vm6 = vcmask 1046532   ;;  %s301_s7 = sand.u32 1, %s3082_s16  }
  0x19   : > { %vm3542_vm7 = vmor %vm1219_vm5, %vm1220_vm6  ;;  %s2947_s29 = sshll.u32 %s3090_s18, 8  ;;  %s2517_s18 = scalar_lea.sflag [#allocation3], %s301_s7 }
  0x1a   : > { %1442 = vmatpush.bf16.msrb.mxu2 %v1433_v3  ;;  %1121 = vmatpush.bf16.msrb.mxu1 %v1112_v8  ;;  %s3212_s24 = scalar_lea.vmem %s4357_s0, %s2951_s14  ;;  %s2928_s11 = sadd.s32 192, %s2951_s14 }
  0x1b   : > { %1576 = vmatpush.bf16.msrb.mxu3 %v1567_v7  ;;  %1732 = vmatpush.bf16.msrb.mxu0 %v1723_v9  ;;  %v3215_v10 = vld [vmem:[%s3212_s24 + $0x30] sm:$0xf]  ;;  %v3218_v11 = vld [vmem:[%s3212_s24 + $0x34] sm:$0xf]  ;;  %v3221_v12 = vld [vmem:[%s3212_s24 + $0x38] sm:$0x1]  ;;  %s3938_s21 = scalar_lea.vmem %s4358_s1, %s2928_s11  ;;  %s2532_s6 = scalar_lea.hbm %s4361_s4, %s2947_s29 }
  0x1c   : > { %v504_v13 = vshrl.u32 %v3215_v10, 16  ;;  %v507_v14 = vshll.u32 %v3215_v10, 16  ;;  %v513_v15 = vshll.u32 %v3218_v11, 16  ;;  %v517_v16 = vshrl.u32 %v3218_v11, 16  ;;  %v373_v17 = vld [vmem:[%s3212_s24 + $0x60] sm:$0xf] }
  0x1d   : > { %v523_v18 = vshll.u32 %v3221_v12, 16  ;;  %v3230_v19 = vld [vmem:[%s3212_s24 + $0x64] sm:$0xf]  ;;  %v375_v20 = vld [vmem:[%s3212_s24 + $0x68] sm:$0x1]  ;;  %v600_v21 = vshrl.u32 %v373_v17, 16 }
  0x1e   : > { %v506_v22 = vrot.slane %v504_v13, 4  ;;  %v509_v23 = vrot.slane %v507_v14, 5  ;;  %v515_v24 = vrot.slane %v513_v15, 5  ;;  %v519_v25 = vrot.slane %v517_v16, 4  ;;  %v385_v26 = vld [vmem:[%s3212_s24 + $0x90] sm:$0xf] }
  0x1f   : > { %v525_v27 = vrot.slane %v523_v18, 5  ;;  %v602_v28 = vrot.slane %v600_v21, 4  ;;  %v603_v29 = vshll.u32 %v373_v17, 16  ;;  %v609_v30 = vshll.u32 %v3230_v19, 16  ;;  %v386_v35 = vld [vmem:[%s3212_s24 + $0x94] sm:$0xf] }
  0x20   : > { %v510_v31 = vor.u32 %v509_v23, %v506_v22  ;;  %v520_v32 = vor.u32 %v519_v25, %v515_v24  ;;  %v613_v33 = vshrl.u32 %v3230_v19, 16  ;;  %v619_v34 = vshll.u32 %v375_v20, 16  ;;  %v387_v45 = vld [vmem:[%s3212_s24 + $0x98] sm:$0x1]  ;;  %v3249_v61 = vld [vmem:[%s3212_s24] sm:$0xf] }
  0x21   : > { %v605_v37 = vrot.slane %v603_v29, 5  ;;  %v611_v38 = vrot.slane %v609_v30, 5  ;;  %v696_v39 = vshrl.u32 %v385_v26, 16  ;;  %v699_v47 = vshll.u32 %v385_v26, 16  ;;  %v3256_v1 = vld [vmem:[%s3212_s24 + $0x4] sm:$0xf] }
  0x22   : > { %v511_v40 = vrot.slane %v510_v31, 4  ;;  %v521_v41 = vrot.slane %v520_v32, 4  ;;  %v615_v42 = vrot.slane %v613_v33, 4  ;;  %v621_v43 = vrot.slane %v619_v34, 5  ;;  %v3259_v2 = vld [vmem:[%s3212_s24 + $0x8] sm:$0x1] }
  0x23   : > { %v606_v44 = vor.u32 %v605_v37, %v602_v28  ;;  %v698_v46 = vrot.slane %v696_v39, 4  ;;  %v705_v48 = vshll.u32 %v386_v35, 16  ;;  %v709_v52 = vshrl.u32 %v386_v35, 16  ;;  %v3275_v23 = vld [vmem:[%s3212_s24 + $0x3c] sm:$0xf]  ;;  %s2535_s9 = sshll.u32 %s2532_s6, 4  ;;  %s2536_s9 = int_to_ptr.hbm [resolvable:$true] %s2535_s9 }
  0x24   : > { %v516_v49 = vsel %vm3239_vm3, %v511_v40, %v515_v24  ;;  %v526_v50 = vsel %vm3239_vm3, %v521_v41, %v525_v27  ;;  %v616_v51 = vor.u32 %v615_v42, %v611_v38  ;;  %v701_v56 = vrot.slane %v699_v47, 5  ;;  %v3278_v24 = vld [vmem:[%s3212_s24 + $0x40] sm:$0xf]  ;;  %v3283_v29 = vld [vmem:[%s3212_s24 + $0x44] sm:$0x1]  ;;  %s3034_s10 = sshra.s32 %s2536_s9, 4  ;;  %s3035_s10 = int_to_ptr.hbm [resolvable:$true] %s3034_s10 }
  0x25   : > { %v801_v53 = vunpack.c.l.b16 %v516_v49  ;;  %v802_v54 = vunpack.c.l.b16 %v526_v50  ;;  %v607_v55 = vrot.slane %v606_v44, 4  ;;  %v707_v58 = vrot.slane %v705_v48, 5  ;;  %v3298_v47 = vld [vmem:[%s3212_s24 + $0x70] sm:$0xf]  ;;  %s3036_s11 = scalar_lea.hbm %s3035_s10, 256  ;;  %p3041_p1 = scmp.lt.s32.totalorder %s3035_s10, %s4361_s4 }
  0x26   : > { %v617_v57 = vrot.slane %v616_v51, 4  ;;  %v711_v59 = vrot.slane %v709_v52, 4  ;;  %v715_v60 = vshll.u32 %v387_v45, 16  ;;  %v702_v0 = vor.u32 %v701_v56, %v698_v46  ;;  %v3305_v51 = vld [vmem:[%s3212_s24 + $0x74] sm:$0x1]  ;;  %p3037_p12 = scmp.ne.s32.totalorder %s3035_s10, %s3036_s11 }
  0x27   : > { %v3251_v62 = vpack.c.b16 %v802_v54, %v801_v53  ;;  %v612_v63 = vsel %vm3239_vm3, %v607_v55, %v611_v38  ;;  %v408_v9 = vshrl.u32 %v3249_v61, 16  ;;  %v411_v13 = vshll.u32 %v3249_v61, 16  ;;  %v3291_v38 = vld [vmem:[%s3212_s24 + $0x6c] sm:$0xf] }
  0x28   : > { %v622_v3 = vsel %vm3239_vm3, %v617_v57, %v621_v43  ;;  %v809_v4 = vunpack.c.l.b16 %v612_v63  ;;  %v712_v5 = vor.u32 %v711_v59, %v707_v58  ;;  %v717_v6 = vrot.slane %v715_v60, 5  ;;  %p3038_p13 = pnand %p3037_p12, %p3167_p4 }
  0x29   : > { %2685 = vmatmul.msk.bf16.vlgmr.msra.gmra.mxu1 %vm841_vm4, %v3251_v62  ;;  %v810_v7 = vunpack.c.l.b16 %v622_v3  ;;  %v703_v8 = vrot.slane %v702_v0, 4  ;;  %v417_v15 = vshll.u32 %v3256_v1, 16  ;;  %v421_v16 = vshrl.u32 %v3256_v1, 16 }
  0x2a   : > { %v713_v14 = vrot.slane %v712_v5, 4  ;;  %v427_v17 = vshll.u32 %v3259_v2, 16  ;;  %v410_v21 = vrot.slane %v408_v9, 4  ;;  %v413_v22 = vrot.slane %v411_v13, 5  ;;  %v388_v5 = vld [vmem:[%s3212_s24 + $0x9c] sm:$0xf]  ;;  %p3039_p0 = pneg %p3038_p13 }
  0x2b   : > { %v3270_v18 = vpack.c.b16 %v810_v7, %v809_v4  ;;  %v708_v20 = vsel %vm3239_vm3, %v703_v8, %v707_v58  ;;  %v419_v27 = vrot.slane %v417_v15, 5  ;;  %v423_v28 = vrot.slane %v421_v16, 4  ;;  %v389_v9 = vld [vmem:[%s3212_s24 + $0xa0] sm:$0xf] }
  0x2c   : > { %v718_v25 = vsel %vm3239_vm3, %v713_v14, %v717_v6  ;;  %v817_v26 = vunpack.c.l.b16 %v708_v20  ;;  %v414_v31 = vor.u32 %v413_v22, %v410_v21  ;;  %v429_v32 = vrot.slane %v427_v17, 5  ;;  %v390_v17 = vld [vmem:[%s3212_s24 + $0xa4] sm:$0x1] }
  0x2d   : > { %4406 = vst [vmem:[#allocation5_spill] sm:$0xff] %v3270_v18  ;;  %2689 = vmatmul.msk.bf16.vlgmr.msra.gmra.mxu2 %vm841_vm4, %v3270_v18  ;;  %v818_v30 = vunpack.c.l.b16 %v718_v25  ;;  %v424_v33 = vor.u32 %v423_v28, %v419_v27  ;;  %v528_v34 = vshrl.u32 %v3275_v23, 16  ;;  %v531_v35 = vshll.u32 %v3275_v23, 16 }
  0x2e   : > { %v537_v37 = vshll.u32 %v3278_v24, 16  ;;  %v415_v40 = vrot.slane %v414_v31, 4  ;;  %v541_v41 = vshrl.u32 %v3278_v24, 16  ;;  %v547_v42 = vshll.u32 %v3283_v29, 16 }
  0x2f   : > { %v3293_v39 = vpack.c.b16 %v818_v30, %v817_v26  ;;  %v425_v43 = vrot.slane %v424_v33, 4  ;;  %v530_v44 = vrot.slane %v528_v34, 4  ;;  %v533_v45 = vrot.slane %v531_v35, 5  ;;  %v3323_v35 = vld [vmem:[%s3212_s24 + $0xc] sm:$0xf] }
  0x30   : > { %v539_v46 = vrot.slane %v537_v37, 5  ;;  %v420_v48 = vsel %vm3239_vm3, %v415_v40, %v419_v27  ;;  %v543_v49 = vrot.slane %v541_v41, 4  ;;  %v549_v50 = vrot.slane %v547_v42, 5 }
  0x31   : > { %4407 = vst [vmem:[#allocation6_spill] sm:$0xff] %v3293_v39  ;;  %2693 = vmatmul.msk.bf16.vlgmr.msra.gmra.mxu3 %vm841_vm4, %v3293_v39  ;;  %v624_v52 = vshrl.u32 %v3291_v38, 16  ;;  %v430_v53 = vsel %vm3239_vm3, %v425_v43, %v429_v32  ;;  %v793_v54 = vunpack.c.l.b16 %v420_v48  ;;  %v534_v55 = vor.u32 %v533_v45, %v530_v44  ;;  %v3330_v43 = vld [vmem:[%s3212_s24 + $0x10] sm:$0xf]  ;;  %v3333_v48 = vld [vmem:[%s3212_s24 + $0x14] sm:$0x1] }
  0x32   : > { %v627_v56 = vshll.u32 %v3291_v38, 16  ;;  %v794_v57 = vunpack.c.l.b16 %v430_v53  ;;  %v544_v58 = vor.u32 %v543_v49, %v539_v46  ;;  %v633_v60 = vshll.u32 %v3298_v47, 16  ;;  %v3510_v39 = vld [vmem:[%s3212_s24 + $0x2c] sm:$0x1] }
  0x33   : > { %v626_v59 = vrot.slane %v624_v52, 4  ;;  %v535_v63 = vrot.slane %v534_v55, 4  ;;  %v637_v3 = vshrl.u32 %v3298_v47, 16  ;;  %v643_v4 = vshll.u32 %v3305_v51, 16 }
  0x34   : > { %v629_v0 = vrot.slane %v627_v56, 5  ;;  %v825_v6 = vpack.c.b16 %v794_v57, %v793_v54  ;;  %v545_v7 = vrot.slane %v544_v58, 4  ;;  %v635_v8 = vrot.slane %v633_v60, 5  ;;  %v3343_v58 = vld [vmem:[%s3212_s24 + $0x48] sm:$0xf] }
  0x35   : > { %v540_v13 = vsel %vm3239_vm3, %v535_v63, %v539_v46  ;;  %v639_v15 = vrot.slane %v637_v3, 4  ;;  %v645_v16 = vrot.slane %v643_v4, 5  ;;  %v720_v22 = vshrl.u32 %v388_v5, 16  ;;  %v3348_v3 = vld [vmem:[%s3212_s24 + $0x4c] sm:$0xf] }
  0x36   : > { %v630_v14 = vor.u32 %v629_v0, %v626_v59  ;;  %2681 = vmatmul.msk.bf16.vlgmr.msra.gmra.mxu0 %vm841_vm4, %v825_v6  ;;  %v550_v20 = vsel %vm3239_vm3, %v545_v7, %v549_v50  ;;  %v803_v21 = vunpack.c.l.b16 %v540_v13  ;;  %v723_v25 = vshll.u32 %v388_v5, 16 }
  0x37   : > { %v804_v26 = vunpack.c.l.b16 %v550_v20  ;;  %v640_v28 = vor.u32 %v639_v15, %v635_v8  ;;  %v729_v30 = vshll.u32 %v389_v9, 16  ;;  %v722_v31 = vrot.slane %v720_v22, 4  ;;  %v3355_v15 = vld [vmem:[%s3212_s24 + $0x50] sm:$0x1] }
  0x38   : > { %v631_v27 = vrot.slane %v630_v14, 4  ;;  %v725_v32 = vrot.slane %v723_v25, 5  ;;  %v733_v33 = vshrl.u32 %v389_v9, 16  ;;  %v739_v34 = vshll.u32 %v390_v17, 16 }
  0x39   : > { %v3325_v37 = vpack.c.b16 %v804_v26, %v803_v21  ;;  %v641_v41 = vrot.slane %v640_v28, 4  ;;  %v731_v42 = vrot.slane %v729_v30, 5  ;;  %v432_v52 = vshrl.u32 %v3323_v35, 16  ;;  %v3366_v28 = vld [vmem:[%s3212_s24 + $0x78] sm:$0xf] }
  0x3a   : > { %v636_v40 = vsel %vm3239_vm3, %v631_v27, %v635_v8  ;;  %v726_v45 = vor.u32 %v725_v32, %v722_v31  ;;  %v735_v46 = vrot.slane %v733_v33, 4  ;;  %v741_v50 = vrot.slane %v739_v34, 5  ;;  %v3370_v34 = vld [vmem:[%s3212_s24 + $0x7c] sm:$0xf] }
  0x3b   : > { %v811_v44 = vunpack.c.l.b16 %v636_v40  ;;  %2686 = vmatmul.msk.bf16.gmra.mxu1 %vm841_vm4, %v3325_v37  ;;  %v646_v49 = vsel %vm3239_vm3, %v641_v41, %v645_v16  ;;  %v435_v53 = vshll.u32 %v3323_v35, 16  ;;  %v441_v57 = vshll.u32 %v3330_v43, 16 }
  0x3c   : > { %v812_v54 = vunpack.c.l.b16 %v646_v49  ;;  %v727_v55 = vrot.slane %v726_v45, 4  ;;  %v736_v56 = vor.u32 %v735_v46, %v731_v42  ;;  %v434_v59 = vrot.slane %v432_v52, 4 }
  0x3d   : > { %v437_v60 = vrot.slane %v435_v53, 5  ;;  %v445_v63 = vshrl.u32 %v3330_v43, 16  ;;  %v451_v0 = vshll.u32 %v3333_v48, 16  ;;  %v443_v7 = vrot.slane %v441_v57, 5 }
  0x3e   : > { %v3350_v4 = vpack.c.b16 %v812_v54, %v811_v44  ;;  %v732_v5 = vsel %vm3239_vm3, %v727_v55, %v731_v42  ;;  %v737_v6 = vrot.slane %v736_v56, 4  ;;  %v552_v17 = vshrl.u32 %v3343_v58, 16 }
  0x3f   : > { %v819_v8 = vunpack.c.l.b16 %v732_v5  ;;  %v438_v9 = vor.u32 %v437_v60, %v434_v59  ;;  %v447_v13 = vrot.slane %v445_v63, 4  ;;  %v453_v14 = vrot.slane %v451_v0, 5 }
  0x40   : > { %2690 = vmatmul.msk.bf16.gmra.mxu2 %vm841_vm4, %v3350_v4  ;;  %v742_v16 = vsel %vm3239_vm3, %v737_v6, %v741_v50  ;;  %v555_v20 = vshll.u32 %v3343_v58, 16  ;;  %v561_v21 = vshll.u32 %v3348_v3, 16  ;;  %v565_v27 = vshrl.u32 %v3348_v3, 16  ;;  %v3377_v50 = vld [vmem:[%s3212_s24 + $0x80] sm:$0x1] }
  0x41   : > { %v820_v22 = vunpack.c.l.b16 %v742_v16  ;;  %v439_v25 = vrot.slane %v438_v9, 4  ;;  %v448_v26 = vor.u32 %v447_v13, %v443_v7  ;;  %v554_v30 = vrot.slane %v552_v17, 4  ;;  %v3396_v16 = vld [vmem:[%s3212_s24 + $0xac] sm:$0xf]  ;;  %v3399_v17 = vld [vmem:[%s3212_s24 + $0xb0] sm:$0x1] }
  0x42   : > { %v557_v31 = vrot.slane %v555_v20, 5  ;;  %v563_v32 = vrot.slane %v561_v21, 5  ;;  %v571_v33 = vshll.u32 %v3355_v15, 16  ;;  %v567_v44 = vrot.slane %v565_v27, 4  ;;  %4410 = vst [vmem:[#allocation9_spill] sm:$0xff] %v3396_v16 }
  0x43   : > { %v3372_v40 = vpack.c.b16 %v820_v22, %v819_v8  ;;  %v444_v41 = vsel %vm3239_vm3, %v439_v25, %v443_v7  ;;  %v449_v42 = vrot.slane %v448_v26, 4  ;;  %v648_v52 = vshrl.u32 %v3366_v28, 16  ;;  %v3389_v8 = vld [vmem:[%s3212_s24 + $0xa8] sm:$0xf]  ;;  %4411 = vst [vmem:[#allocation10_spill] sm:$0xff] %v3399_v17 }
  0x44   : > { %v795_v45 = vunpack.c.l.b16 %v444_v41  ;;  %v558_v46 = vor.u32 %v557_v31, %v554_v30  ;;  %v573_v49 = vrot.slane %v571_v33, 5  ;;  %v568_v54 = vor.u32 %v567_v44, %v563_v32  ;;  %4409 = vst [vmem:[#allocation8_spill] sm:$0xff] %v3389_v8 }
  0x45   : > { %4408 = vst [vmem:[#allocation7_spill] sm:$0xff] %v3372_v40  ;;  %2694 = vmatmul.msk.bf16.gmra.mxu3 %vm841_vm4, %v3372_v40  ;;  %v454_v53 = vsel %vm3239_vm3, %v449_v42, %v453_v14  ;;  %v651_v55 = vshll.u32 %v3366_v28, 16  ;;  %v657_v56 = vshll.u32 %v3370_v34, 16  ;;  %v650_v60 = vrot.slane %v648_v52, 4  ;;  %v3413_v52 = vld [vmem:[%s3212_s24 + $0x18] sm:$0xf] }
  0x46   : > { %v796_v57 = vunpack.c.l.b16 %v454_v53  ;;  %v559_v59 = vrot.slane %v558_v46, 4  ;;  %v661_v63 = vshrl.u32 %v3370_v34, 16  ;;  %v569_v0 = vrot.slane %v568_v54, 4  ;;  %v3499_v40 = vld [vmem:[%s3212_s24 + $0x24] sm:$0xf] }
  0x47   : > { %v653_v5 = vrot.slane %v651_v55, 5  ;;  %v659_v6 = vrot.slane %v657_v56, 5  ;;  %v667_v7 = vshll.u32 %v3377_v50, 16  ;;  %v744_v30 = vshrl.u32 %v3389_v8, 16  ;;  %v3418_v56 = vld [vmem:[%s3212_s24 + $0x1c] sm:$0xf] }
  0x48   : > { %v3391_v9 = vpack.c.b16 %v796_v57, %v795_v45  ;;  %v564_v13 = vsel %vm3239_vm3, %v559_v59, %v563_v32  ;;  %v663_v14 = vrot.slane %v661_v63, 4  ;;  %v574_v20 = vsel %vm3239_vm3, %v569_v0, %v573_v49  ;;  %v3421_v57 = vld [vmem:[%s3212_s24 + $0x20] sm:$0x1] }
  0x49   : > { %v805_v21 = vunpack.c.l.b16 %v564_v13  ;;  %v654_v22 = vor.u32 %v653_v5, %v650_v60  ;;  %v669_v25 = vrot.slane %v667_v7, 5  ;;  %v806_v26 = vunpack.c.l.b16 %v574_v20 }
  0x4a   : > { %2682 = vmatmul.msk.bf16.gmra.mxu0 %vm841_vm4, %v3391_v9  ;;  %v664_v27 = vor.u32 %v663_v14, %v659_v6  ;;  %v747_v31 = vshll.u32 %v3389_v8, 16  ;;  %v753_v33 = vshll.u32 %v3396_v16, 16  ;;  %v757_v41 = vshrl.u32 %v3396_v16, 16 }
  0x4b   : > { %v655_v32 = vrot.slane %v654_v22, 4  ;;  %v763_v42 = vshll.u32 %v3399_v17, 16  ;;  %v3410_v44 = vpack.c.b16 %v806_v26, %v805_v21  ;;  %v746_v46 = vrot.slane %v744_v30, 4  ;;  %v3433_v26 = vld [vmem:[%s3212_s24 + $0x54] sm:$0xf] }
  0x4c   : > { %v665_v45 = vrot.slane %v664_v27, 4  ;;  %v749_v49 = vrot.slane %v747_v31, 5  ;;  %v755_v54 = vrot.slane %v753_v33, 5  ;;  %v759_v55 = vrot.slane %v757_v41, 4  ;;  %v3477_v17 = vld [vmem:[%s3212_s24 + $0xb4] sm:$0xf] }
  0x4d   : > { %4412 = vst [vmem:[#allocation11_spill] sm:$0xff] %v3410_v44  ;;  %v660_v53 = vsel %vm3239_vm3, %v655_v32, %v659_v6  ;;  %2687 = vmatmul.msk.bf16.gmra.mxu1 %vm841_vm4, %v3410_v44  ;;  %v765_v0 = vrot.slane %v763_v42, 5  ;;  %v456_v6 = vshrl.u32 %v3413_v52, 16  ;;  %v459_v13 = vshll.u32 %v3413_v52, 16  ;;  %v3438_v32 = vld [vmem:[%s3212_s24 + $0x58] sm:$0xf] }
  0x4e   : > { %v670_v59 = vsel %vm3239_vm3, %v665_v45, %v669_v25  ;;  %v813_v60 = vunpack.c.l.b16 %v660_v53  ;;  %v750_v63 = vor.u32 %v749_v49, %v746_v46  ;;  %v760_v7 = vor.u32 %v759_v55, %v755_v54  ;;  %v3443_v46 = vld [vmem:[%s3212_s24 + $0x5c] sm:$0x1]  ;;  %4415 = vst [vmem:[#allocation14_spill] sm:$0xff] %v3477_v17 }
  0x4f   : > { %v814_v5 = vunpack.c.l.b16 %v670_v59  ;;  %v465_v20 = vshll.u32 %v3418_v56, 16  ;;  %v469_v21 = vshrl.u32 %v3418_v56, 16  ;;  %v475_v22 = vshll.u32 %v3421_v57, 16 }
  0x50   : > { %v751_v14 = vrot.slane %v750_v63, 4  ;;  %v761_v27 = vrot.slane %v760_v7, 4  ;;  %v458_v30 = vrot.slane %v456_v6, 4  ;;  %v461_v31 = vrot.slane %v459_v13, 5  ;;  %v3453_v7 = vld [vmem:[%s3212_s24 + $0x84] sm:$0xf] }
  0x51   : > { %v3435_v25 = vpack.c.b16 %v814_v5, %v813_v60  ;;  %v467_v41 = vrot.slane %v465_v20, 5  ;;  %v471_v42 = vrot.slane %v469_v21, 4  ;;  %v477_v45 = vrot.slane %v475_v22, 5  ;;  %4413 = vst [vmem:[#allocation12_spill] sm:$0xff] %v3453_v7 }
  0x52   : > { %v756_v33 = vsel %vm3239_vm3, %v751_v14, %v755_v54  ;;  %v766_v49 = vsel %vm3239_vm3, %v761_v27, %v765_v0  ;;  %v462_v55 = vor.u32 %v461_v31, %v458_v30  ;;  %v576_v59 = vshrl.u32 %v3433_v26, 16  ;;  %v3460_v30 = vld [vmem:[%s3212_s24 + $0x88] sm:$0xf] }
  0x53   : > { %2691 = vmatmul.msk.bf16.gmra.mxu2 %vm841_vm4, %v3435_v25  ;;  %v821_v53 = vunpack.c.l.b16 %v756_v33  ;;  %v822_v60 = vunpack.c.l.b16 %v766_v49  ;;  %v472_v63 = vor.u32 %v471_v42, %v467_v41  ;;  %v579_v54 = vshll.u32 %v3433_v26, 16  ;;  %v3465_v49 = vld [vmem:[%s3212_s24 + $0x8c] sm:$0x1] }
  0x54   : > { %v585_v5 = vshll.u32 %v3438_v32, 16  ;;  %v463_v6 = vrot.slane %v462_v55, 4  ;;  %v578_v13 = vrot.slane %v576_v59, 4  ;;  %v589_v14 = vshrl.u32 %v3438_v32, 16 }
  0x55   : > { %v595_v0 = vshll.u32 %v3443_v46, 16  ;;  %v3457_v20 = vpack.c.b16 %v822_v60, %v821_v53  ;;  %v473_v21 = vrot.slane %v472_v63, 4  ;;  %v581_v22 = vrot.slane %v579_v54, 5 }
  0x56   : > { %v587_v27 = vrot.slane %v585_v5, 5  ;;  %v468_v31 = vsel %vm3239_vm3, %v463_v6, %v467_v41  ;;  %v591_v33 = vrot.slane %v589_v14, 4  ;;  %v672_v55 = vshrl.u32 %v3453_v7, 16 }
  0x57   : > { %4414 = vst [vmem:[#allocation13_spill] sm:$0xff] %v3457_v20  ;;  %v597_v42 = vrot.slane %v595_v0, 5  ;;  %2695 = vmatmul.msk.bf16.gmra.mxu3 %vm841_vm4, %v3457_v20  ;;  %v478_v53 = vsel %vm3239_vm3, %v473_v21, %v477_v45  ;;  %v797_v59 = vunpack.c.l.b16 %v468_v31  ;;  %v582_v60 = vor.u32 %v581_v22, %v578_v13  ;;  %v3482_v22 = vld [vmem:[%s3212_s24 + $0xb8] sm:$0xf] }
  0x58   : > { %v675_v63 = vshll.u32 %v3453_v7, 16  ;;  %v798_v54 = vunpack.c.l.b16 %v478_v53  ;;  %v592_v41 = vor.u32 %v591_v33, %v587_v27  ;;  %v674_v5 = vrot.slane %v672_v55, 4  ;;  %4416 = vst [vmem:[#allocation15_spill] sm:$0xff] %v3482_v22 }
  0x59   : > { %v681_v6 = vshll.u32 %v3460_v30, 16  ;;  %v583_v14 = vrot.slane %v582_v60, 4  ;;  %v685_v8 = vshrl.u32 %v3460_v30, 16  ;;  %v691_v20 = vshll.u32 %v3465_v49, 16  ;;  %v3487_v60 = vld [vmem:[%s3212_s24 + $0xbc] sm:$0x1] }
  0x5a   : > { %v677_v0 = vrot.slane %v675_v63, 5  ;;  %v3479_v45 = vpack.c.b16 %v798_v54, %v797_v59  ;;  %v593_v21 = vrot.slane %v592_v41, 4  ;;  %4417 = vst [vmem:[#allocation16_spill] sm:$0xff] %v3487_v60  ;;  %v768_v54 = vshrl.u32 %v3477_v17, 16 }
  0x5b   : > { %v683_v13 = vrot.slane %v681_v6, 5  ;;  %v588_v31 = vsel %vm3239_vm3, %v583_v14, %v587_v27  ;;  %v687_v55 = vrot.slane %v685_v8, 4  ;;  %v693_v53 = vrot.slane %v691_v20, 5 }
  0x5c   : > { %v678_v33 = vor.u32 %v677_v0, %v674_v5  ;;  %2683 = vmatmul.msk.bf16.gmra.mxu0 %vm841_vm4, %v3479_v45  ;;  %v598_v59 = vsel %vm3239_vm3, %v593_v21, %v597_v42  ;;  %v807_v63 = vunpack.c.l.b16 %v588_v31  ;;  %v771_v41 = vshll.u32 %v3477_v17, 16 }
  0x5d   : > { %v808_v6 = vunpack.c.l.b16 %v598_v59  ;;  %v688_v5 = vor.u32 %v687_v55, %v683_v13  ;;  %v777_v8 = vshll.u32 %v3482_v22, 16  ;;  %v770_v20 = vrot.slane %v768_v54, 4 }
  0x5e   : > { %v679_v27 = vrot.slane %v678_v33, 4  ;;  %v773_v14 = vrot.slane %v771_v41, 5  ;;  %v781_v0 = vshrl.u32 %v3482_v22, 16  ;;  %v787_v16 = vshll.u32 %v3487_v60, 16  ;;  %v3506_v33 = vld [vmem:[%s3212_s24 + $0x28] sm:$0xf] }
  0x5f   : > { %v3501_v42 = vpack.c.b16 %v808_v6, %v807_v63  ;;  %v689_v31 = vrot.slane %v688_v5, 4  ;;  %v779_v59 = vrot.slane %v777_v8, 5  ;;  %v1227_v55 = vrot.slane %v3259_v2, 5 }
  0x60   : > { %v684_v21 = vsel %vm3239_vm3, %v679_v27, %v683_v13  ;;  %v774_v54 = vor.u32 %v773_v14, %v770_v20  ;;  %v783_v41 = vrot.slane %v781_v0, 4  ;;  %v789_v6 = vrot.slane %v787_v16, 5 }
  0x61   : > { %4418 = vst [vmem:[#allocation17_spill] sm:$0xff] %v3501_v42  ;;  %v815_v17 = vunpack.c.l.b16 %v684_v21  ;;  %2688 = vmatmul.msk.bf16.gmra.mxu1 %vm841_vm4, %v3501_v42  ;;  %v694_v63 = vsel %vm3239_vm3, %v689_v31, %v693_v53  ;;  %v480_v13 = vshrl.u32 %v3499_v40, 16  ;;  %v483_v27 = vshll.u32 %v3499_v40, 16 }
  0x62   : > { %v816_v5 = vunpack.c.l.b16 %v694_v63  ;;  %v775_v8 = vrot.slane %v774_v54, 4  ;;  %v784_v60 = vor.u32 %v783_v41, %v779_v59  ;;  %v489_v2 = vshll.u32 %v3506_v33, 16  ;;  %v2866_v54 = vld [vmem:[%s4359_s2 + $0xc] sm:$0x3]  ;;  %v2887_v41 = vld [vmem:[%s4359_s2 + $0xe] sm:$0x3] }
  0x63   : > { %v482_v20 = vrot.slane %v480_v13, 4  ;;  %v485_v14 = vrot.slane %v483_v27, 5  ;;  %v493_v0 = vshrl.u32 %v3506_v33, 16  ;;  %v499_v21 = vshll.u32 %v3510_v39, 16 }
  0x64   : > { %v3521_v22 = vpack.c.b16 %v816_v5, %v815_v17  ;;  %v780_v16 = vsel %vm3239_vm3, %v775_v8, %v779_v59  ;;  %v785_v53 = vrot.slane %v784_v60, 4  ;;  %v491_v31 = vrot.slane %v489_v2, 5  ;;  %v2849_v17 = vld [vmem:[%s4359_s2 + $0xa] sm:$0x3]  ;;  %v2905_v60 = vld [vmem:[%s4359_s2 + $0x10] sm:$0x3] }
  0x65   : > { %v823_v63 = vunpack.c.l.b16 %v780_v16  ;;  %v486_v13 = vor.u32 %v485_v14, %v482_v20  ;;  %v495_v27 = vrot.slane %v493_v0, 4  ;;  %v501_v7 = vrot.slane %v499_v21, 5 }
  0x66   : > { %4419 = vst [vmem:[#allocation18_spill] sm:$0xff] %v3521_v22  ;;  %2692 = vmatmul.msk.bf16.gmra.mxu2 %vm841_vm4, %v3521_v22  ;;  %v790_v59 = vsel %vm3239_vm3, %v785_v53, %v789_v6  ;;  %v2777_v5 = vrot.slane %v3249_v61, 9  ;;  %v1224_v0 = vrot.slane %v3256_v1, 5  ;;  %v1997_v21 = vsel %vm890_vm0, %v2866_v54, 0 }
  0x67   : > { %v824_v8 = vunpack.c.l.b16 %v790_v59  ;;  %v487_v2 = vrot.slane %v486_v13, 4  ;;  %v496_v20 = vor.u32 %v495_v27, %v491_v31  ;;  %v2153_v16 = vsel %vm890_vm0, %v2887_v41, 0  ;;  %2006 = vmatpush.bf16.msra.mxu2 %v1997_v21  ;;  %v2930_v21 = vld [vmem:[%s3212_s24 + $0xc] sm:$0xff] }
  0x68   : > { %v1863_v22 = vsel %vm890_vm0, %v2849_v17, 0  ;;  %v2293_v6 = vsel %vm890_vm0, %v2905_v60, 0  ;;  %v1225_v27 = vsel %vm3542_vm7, %v2777_v5, %v1224_v0  ;;  %2162 = vmatpush.bf16.msra.mxu3 %v2153_v16  ;;  %v1226_v54 = vrot.slane %v1224_v0, 4 }
  0x69   : > { %v3551_v53 = vpack.c.b16 %v824_v8, %v823_v63  ;;  %v492_v61 = vsel %vm3239_vm3, %v487_v2, %v491_v31  ;;  %v497_v13 = vrot.slane %v496_v20, 4  ;;  %1872 = vmatpush.bf16.msra.mxu1 %v1863_v22  ;;  %2302 = vmatpush.bf16.msra.mxu0 %v2293_v6  ;;  %v2778_v41 = vrot.slane %v3323_v35, 9  ;;  %v2929_v22 = vld [vmem:[%s3212_s24] sm:$0xff]  ;;  %v3588_v6 = vld [vmem:[%s3212_s24 + $0x18] sm:$0xff] }
  0x6a   : > { %v799_v1 = vunpack.c.l.b16 %v492_v61  ;;  %v1336_v31 = vunpack.c.l.b16 %v1225_v27  ;;  %v1231_v17 = vrot.slane %v3330_v43, 5  ;;  %v1234_v60 = vrot.slane %v3333_v48, 5 }
  0x6b   : > { %2696 = vmatmul.msk.bf16.gmra.mxu3 %vm841_vm4, %v3551_v53  ;;  %v502_v63 = vsel %vm3239_vm3, %v497_v13, %v501_v7  ;;  %v1228_v5 = vsel %vm3542_vm7, %v1226_v54, %v1227_v55  ;;  %v1238_v16 = vrot.slane %v3418_v56, 5  ;;  %v2779_v61 = vrot.slane %v3413_v52, 9 }
  0x6c   : > { %v800_v59 = vunpack.c.l.b16 %v502_v63  ;;  %v1337_v8 = vunpack.c.l.b16 %v1228_v5  ;;  %v1232_v35 = vsel %vm3542_vm7, %v2778_v41, %v1231_v17  ;;  %v1233_v2 = vrot.slane %v1231_v17, 4  ;;  %v3608_v41 = vld [vmem:[%s3212_s24 + $0x24] sm:$0xff] }
  0x6d   : > { %v1338_v7 = vunpack.c.l.b16 %v1232_v35  ;;  %v1240_v13 = vrot.slane %v1238_v16, 4  ;;  %v1241_v27 = vrot.slane %v3421_v57, 5  ;;  %v1245_v57 = vrot.slane %v3506_v33, 5 }
  0x6e   : > { %v3569_v20 = vpack.c.b16 %v800_v59, %v799_v1  ;;  %v1368_v0 = vpack.c.b16 %v1337_v8, %v1336_v31  ;;  %v1235_v43 = vsel %vm3542_vm7, %v1233_v2, %v1234_v60  ;;  %v2780_v63 = vrot.slane %v3499_v40, 9  ;;  %v3630_v8 = vld [vmem:[%s3212_s24 + $0x30] sm:$0xff] }
  0x6f   : > { %v1339_v48 = vunpack.c.l.b16 %v1235_v43  ;;  %v1242_v56 = vsel %vm3542_vm7, %v1240_v13, %v1241_v27  ;;  %v1247_v31 = vrot.slane %v1245_v57, 4  ;;  %v1248_v17 = vrot.slane %v3510_v39, 5  ;;  %v3658_v27 = vld [vmem:[%s3212_s24 + $0x3c] sm:$0xff] }
  0x70   : > { %2684 = vmatmul.msk.bf16.gmra.mxu0 %vm841_vm4, %v3569_v20  ;;  %v1341_v54 = vunpack.c.l.b16 %v1242_v56  ;;  %v1246_v60 = vsel %vm3542_vm7, %v2780_v63, %v1245_v57  ;;  %v1252_v39 = vrot.slane %v3218_v11, 5  ;;  %v2781_v35 = vrot.slane %v3215_v10, 9 }
  0x71   : > { %2761 = vmatmul.msk.bf16.vlgmr.msrb.gmra.mxu1 %vm841_vm4, %v2929_v22  ;;  %v3576_v55 = vpack.c.b16 %v1339_v48, %v1338_v7  ;;  %v1249_v33 = vsel %vm3542_vm7, %v1247_v31, %v1248_v17  ;;  %v1342_v59 = vunpack.c.l.b16 %v1246_v60  ;;  %v1255_v7 = vrot.slane %v3221_v12, 5 }
  0x72   : > { %v1343_v5 = vunpack.c.l.b16 %v1249_v33  ;;  %v1254_v2 = vrot.slane %v1252_v39, 4  ;;  %v1259_v13 = vrot.slane %v3278_v24, 5  ;;  %v2782_v56 = vrot.slane %v3275_v23, 9 }
  0x74   : > { %v3622_v40 = vpack.c.b16 %v1343_v5, %v1342_v59  ;;  %v1256_v11 = vsel %vm3542_vm7, %v1254_v2, %v1255_v7  ;;  %v1260_v24 = vsel %vm3542_vm7, %v2782_v56, %v1259_v13  ;;  %v1266_v5 = vrot.slane %v3348_v3, 5 }
  0x75   : > { %v1346_v23 = vunpack.c.l.b16 %v1260_v24  ;;  %v2783_v7 = vrot.slane %v3343_v58, 9  ;;  %v1273_v24 = vrot.slane %v3438_v32, 5 }
  0x76   : > { %2794 = vmatmul.msk.bf16.vlgmr.msrb.gmra.mxu2 %vm841_vm4, %v1368_v0  ;;  %v1253_v0 = vsel %vm3542_vm7, %v2781_v35, %v1252_v39  ;;  %v3692_v35 = vld [vmem:[%s3212_s24 + $0x48] sm:$0xff] }
  0x77   : > { %v1344_v48 = vunpack.c.l.b16 %v1253_v0  ;;  %4424 = vst [vmem:[#allocation21_spill] sm:$0xff] %v3692_v35  ;;  %v1268_v0 = vrot.slane %v1266_v5, 4 }
  0x7b   : > { %2815 = vmatmul.msk.bf16.vlgmr.msrb.gmra.mxu3 %vm841_vm4, %v2930_v21 }
  0x80   : > { %2832 = vmatmul.msk.bf16.vlgmr.msrb.gmra.mxu0 %vm841_vm4, %v3391_v9  ;;  %v1239_v9 = vsel %vm3542_vm7, %v2779_v61, %v1238_v16 }
  0x81   : > { %2762 = vmatmul.msk.bf16.gmra.mxu1 %vm841_vm4, %v2930_v21  ;;  %v1340_v1 = vunpack.c.l.b16 %v1239_v9  ;;  %v1345_v21 = vunpack.c.l.b16 %v1256_v11  ;;  %v1269_v11 = vrot.slane %v3355_v15, 5 }
  0x83   : > { %v3602_v52 = vpack.c.b16 %v1341_v54, %v1340_v1  ;;  %v3650_v12 = vpack.c.b16 %v1345_v21, %v1344_v48  ;;  %v1261_v1 = vrot.slane %v1259_v13, 4  ;;  %v1262_v54 = vrot.slane %v3283_v29, 5 }
  0x84   : > { %v1267_v21 = vsel %vm3542_vm7, %v2783_v7, %v1266_v5  ;;  %v1270_v13 = vsel %vm3542_vm7, %v1268_v0, %v1269_v11  ;;  %v2784_v5 = vrot.slane %v3433_v26, 9  ;;  %v1275_v7 = vrot.slane %v1273_v24, 4 }
  0x85   : > { %v1263_v63 = vsel %vm3542_vm7, %v1261_v1, %v1262_v54  ;;  %v1348_v56 = vunpack.c.l.b16 %v1267_v21  ;;  %v1349_v1 = vunpack.c.l.b16 %v1270_v13  ;;  %v1276_v0 = vrot.slane %v3443_v46, 5 }
  0x86   : > { %2795 = vmatmul.msk.bf16.gmra.mxu2 %vm841_vm4, %v3576_v55  ;;  %v1347_v60 = vunpack.c.l.b16 %v1263_v63  ;;  %v1274_v32 = vsel %vm3542_vm7, %v2784_v5, %v1273_v24  ;;  %v1280_v5 = vrot.slane %v3230_v19, 5 }
  0x87   : > { %v3716_v54 = vpack.c.b16 %v1349_v1, %v1348_v56  ;;  %v1277_v13 = vsel %vm3542_vm7, %v1275_v7, %v1276_v0  ;;  %v1350_v56 = vunpack.c.l.b16 %v1274_v32  ;;  %v3012_v32 = vld [vmem:[%s3212_s24 + $0x68] sm:$0x1] }
  0x88   : > { %v3682_v33 = vpack.c.b16 %v1347_v60, %v1346_v23  ;;  %v3726_v60 = vld [vmem:[%s3212_s24 + $0x54] sm:$0xff]  ;;  %v1351_v46 = vunpack.c.l.b16 %v1277_v13  ;;  %v1283_v13 = vrot.slane %v3012_v32, 5 }
  0x89   : > { %4427 = vst [vmem:[#allocation24_spill] sm:$0xff] %v3716_v54 }
  0x8a   : > { %4428 = vst [vmem:[#allocation25_spill] sm:$0xff] %v3726_v60 }
  0x8b   : > { %2816 = vmatmul.msk.bf16.gmra.mxu3 %vm841_vm4, %v3588_v6 }
  0x90   : > { %2833 = vmatmul.msk.bf16.gmra.mxu0 %vm841_vm4, %v3479_v45 }
  0x91   : > { %2763 = vmatmul.msk.bf16.gmra.mxu1 %vm841_vm4, %v3588_v6 }
  0x96   : > { %2796 = vmatmul.msk.bf16.gmra.mxu2 %vm841_vm4, %v3602_v52 }
  0x9b   : > { %2817 = vmatmul.msk.bf16.gmra.mxu3 %vm841_vm4, %v3608_v41 }
  0xa0   : > { %2834 = vmatmul.msk.bf16.gmra.mxu0 %vm841_vm4, %v3569_v20 }
  0xa1   : > { %2764 = vmatmul.msk.bf16.gmra.mxu1 %vm841_vm4, %v3608_v41 }
  0xa6   : > { %v3625_v22 = vpop.f32.mrf.mxu1  ;;  %2797 = vmatmul.msk.bf16.gmra.mxu2 %vm841_vm4, %v3622_v40 }
  0xab   : > { %2818 = vmatmul.msk.bf16.gmra.mxu3 %vm841_vm4, %v3630_v8 }
  0xae   : > { %v3640_v43 = vpop.f32.mrf.mxu1 }
  0xb0   : > { %v3642_v16 = vpop.f32.mrf.mxu2  ;;  %2835 = vmatmul.msk.bf16.gmra.mxu0 %vm841_vm4, %v3251_v62 }
  0xb1   : > { %2765 = vmatmul.msk.bf16.gmra.mxu1 %vm841_vm4, %v3630_v8 }
  0xb3   : > { %v3648_v10 = vpop.f32.mrf.mxu0 }
  0xb4   : > { %v3652_v61 = vpop.f32.mrf.mxu3 }
  0xb5   : > { %4422 = vst [vmem:[#allocation19_spill] sm:$0xff] %v3652_v61 }
  0xb6   : > { %2798 = vmatmul.msk.bf16.gmra.mxu2 %vm841_vm4, %v3650_v12 }
  0xb8   : > { %v3660_v9 = vpop.f32.mrf.mxu1  ;;  %v3664_v57 = vpop.f32.mrf.mxu2 }
  0xbb   : > { %2819 = vmatmul.msk.bf16.gmra.mxu3 %vm841_vm4, %v3658_v27  ;;  %v3672_v31 = vpop.f32.mrf.mxu0 }
  0xbc   : > { %v3674_v17 = vpop.f32.mrf.mxu3 }
  0xbd   : > { %4423 = vst [vmem:[#allocation20_spill] sm:$0xff] %v3674_v17 }
  0xc0   : > { %2836 = vmatmul.msk.bf16.gmra.mxu0 %vm841_vm4, %v3325_v37  ;;  %v3678_v29 = vpop.f32.mrf.mxu1 }
  0xc1   : > { %2766 = vmatmul.msk.bf16.gmra.mxu1 %vm841_vm4, %v3658_v27 }
  0xc3   : > { %v3684_v59 = vpop.f32.mrf.mxu2 }
  0xc6   : > { %2799 = vmatmul.msk.bf16.gmra.mxu2 %vm841_vm4, %v3682_v33 }
  0xc7   : > { %v3687_v39 = vpop.f32.mrf.mxu0 }
  0xc8   : > { %v3694_v2 = vpop.f32.mrf.mxu3 }
  0xc9   : > { %4425 = vst [vmem:[#allocation22_spill] sm:$0xff] %v3694_v2 }
  0xca   : > { %v3698_v48 = vpop.f32.mrf.mxu1 }
  0xcb   : > { %2820 = vmatmul.msk.bf16.gmra.mxu3 %vm841_vm4, %v3692_v35  ;;  %v3702_v3 = vpop.f32.mrf.mxu2 }
  0xcf   : > { %v3708_v58 = vpop.f32.mrf.mxu0 }
  0xd0   : > { %2837 = vmatmul.msk.bf16.gmra.mxu0 %vm841_vm4, %v3410_v44  ;;  %v3712_v15 = vpop.f32.mrf.mxu3 }
  0xd1   : > { %4426 = vst [vmem:[#allocation23_spill] sm:$0xff] %v3712_v15  ;;  %2767 = vmatmul.msk.bf16.gmra.mxu1 %vm841_vm4, %v3692_v35  ;;  %v3761_v15 = vld [vmem:[%s3212_s24 + $0x60] sm:$0xff] }
  0xd2   : > { %v3719_v63 = vpop.f32.mrf.mxu1  ;;  %4432 = vst [vmem:[#allocation29_spill] sm:$0xff] %v3761_v15 }
  0xd6   : > { %v3721_v23 = vpop.f32.mrf.mxu2  ;;  %2800 = vmatmul.msk.bf16.gmra.mxu2 %vm841_vm4, %v3716_v54 }
  0xd9   : > { %v3730_v11 = vpop.f32.mrf.mxu0 }
  0xda   : > { %v3732_v21 = vpop.f32.mrf.mxu3 }
  0xdb   : > { %4429 = vst [vmem:[#allocation26_spill] sm:$0xff] %v3732_v21  ;;  %2821 = vmatmul.msk.bf16.gmra.mxu3 %vm841_vm4, %v3726_v60  ;;  %v3748_v21 = vpack.c.b16 %v1351_v46, %v1350_v56 }
  0xdd   : > { %4430 = vst [vmem:[#allocation27_spill] sm:$0xff] %v3748_v21 }
  0xde   : > { %v3740_v26 = vpop.f32.mrf.mxu1  ;;  %v3742_v1 = vpop.f32.mrf.mxu2 }
  0xe0   : > { %2838 = vmatmul.msk.bf16.gmra.mxu0 %vm841_vm4, %v3501_v42  ;;  %v3013_v42 = vld [vmem:[%s3212_s24 + $0x60] sm:$0xf] }
  0xe1   : > { %2768 = vmatmul.msk.bf16.gmra.mxu1 %vm841_vm4, %v3726_v60  ;;  %v3750_v24 = vpop.f32.mrf.mxu0  ;;  %v2785_v2 = vrot.slane %v3013_v42, 9  ;;  %v1282_v60 = vrot.slane %v1280_v5, 4 }
  0xe2   : > { %v3753_v7 = vpop.f32.mrf.mxu3 }
  0xe3   : > { %4431 = vst [vmem:[#allocation28_spill] sm:$0xff] %v3753_v7  ;;  %v1281_v19 = vsel %vm3542_vm7, %v2785_v2, %v1280_v5  ;;  %v1284_v46 = vsel %vm3542_vm7, %v1282_v60, %v1283_v13  ;;  %v1287_v60 = vrot.slane %v3298_v47, 5 }
  0xe4   : > { %v1352_v17 = vunpack.c.l.b16 %v1281_v19  ;;  %v1353_v42 = vunpack.c.l.b16 %v1284_v46  ;;  %v3794_v19 = vld [vmem:[%s3212_s24 + $0x6c] sm:$0xff] }
  0xe6   : > { %2801 = vmatmul.msk.bf16.gmra.mxu2 %vm841_vm4, %v3748_v21  ;;  %v3757_v0 = vpop.f32.mrf.mxu1  ;;  %v3783_v2 = vpack.c.b16 %v1353_v42, %v1352_v17  ;;  %v1289_v17 = vrot.slane %v1287_v60, 4 }
  0xe8   : > { %4434 = vst [vmem:[#allocation31_spill] sm:$0xff] %v3783_v2 }
  0xe9   : > { %v3764_v56 = vpop.f32.mrf.mxu2 }
  0xeb   : > { %2822 = vmatmul.msk.bf16.gmra.mxu3 %vm841_vm4, %v3761_v15 }
  0xed   : > { %v3772_v7 = vpop.f32.mrf.mxu0 }
  0xee   : > { %v3774_v32 = vpop.f32.mrf.mxu3  ;;  %v1123_v21 = vpop.f32.mrf.mxu1 }
  0xef   : > { %4433 = vst [vmem:[#allocation30_spill] sm:$0xff] %v3774_v32  ;;  %v1124_v54 = vadd.f32 %v1123_v21, %v3648_v10  ;;  %v1290_v21 = vrot.slane %v3305_v51, 5  ;;  %v2786_v32 = vrot.slane %v3291_v38, 9 }
  0xf0   : > { %2839 = vmatmul.msk.bf16.gmra.mxu0 %vm841_vm4, %v3270_v18 }
  0xf1   : > { %v3779_v44 = vpop.f32.mrf.mxu2  ;;  %2769 = vmatmul.msk.bf16.gmra.mxu1 %vm841_vm4, %v3761_v15  ;;  %v1288_v47 = vsel %vm3542_vm7, %v2786_v32, %v1287_v60 }
  0xf2   : > { %v1354_v61 = vunpack.c.l.b16 %v1288_v47 }
  0xf5   : > { %v3786_v5 = vpop.f32.mrf.mxu0 }
  0xf6   : > { %v3788_v13 = vpop.f32.mrf.mxu3  ;;  %2802 = vmatmul.msk.bf16.gmra.mxu2 %vm841_vm4, %v3783_v2  ;;  %v1125_v10 = vpop.f32.mrf.mxu1 }
  0xf7   : > { %4435 = vst [vmem:[#allocation32_spill] sm:$0xff] %v3788_v13  ;;  %v1126_v46 = vadd.f32 %v1125_v10, %v3672_v31  ;;  %v1291_v13 = vsel %vm3542_vm7, %v1289_v17, %v1290_v21  ;;  %v1294_v21 = vrot.slane %v3370_v34, 5 }
  0xf8   : > { %v1355_v35 = vunpack.c.l.b16 %v1291_v13  ;;  %v1297_v13 = vrot.slane %v3377_v50, 5 }
  0xf9   : > { %v1444_v42 = vpop.f32.mrf.mxu2 }
  0xfa   : > { %v1524_v18 = vadd.f32 %v1444_v42, %v1124_v54  ;;  %v3811_v10 = vpack.c.b16 %v1355_v35, %v1354_v61  ;;  %v3818_v42 = vld [vmem:[%s3212_s24 + $0x78] sm:$0xff] }
  0xfb   : > { %2823 = vmatmul.msk.bf16.gmra.mxu3 %vm841_vm4, %v3794_v19 }
  0xfd   : > { %v1734_v2 = vpop.f32.mrf.mxu0 }
  0xfe   : > { %v1578_v51 = vpop.f32.mrf.mxu3  ;;  %v1128_v15 = vpop.f32.mrf.mxu1 }
  0xff   : > { %v1658_v31 = vadd.f32 %v1578_v51, %v1524_v18  ;;  %v1129_v38 = vadd.f32 %v1128_v15, %v3687_v39 }
 0x100   : > { %2840 = vmatmul.msk.bf16.gmra.mxu0 %vm841_vm4, %v3350_v4 }
 0x101   : > { %v1446_v54 = vpop.f32.mrf.mxu2  ;;  %2770 = vmatmul.msk.bf16.gmra.mxu1 %vm841_vm4, %v3794_v19  ;;  %v3809_v32 = vadd.f32 %v1734_v2, %v1658_v31  ;;  %v2787_v2 = vrot.slane %v3366_v28, 9 }
 0x102   : > { %v1525_v60 = vadd.f32 %v1446_v54, %v1126_v46  ;;  %v1296_v46 = vrot.slane %v1294_v21, 4 }
 0x103   : > { %v1295_v50 = vsel %vm3542_vm7, %v2787_v2, %v1294_v21 }
 0x104   : > { %v1298_v51 = vsel %vm3542_vm7, %v1296_v46, %v1297_v13  ;;  %v1304_v46 = vrot.slane %v3465_v49, 5 }
 0x105   : > { %v1736_v17 = vpop.f32.mrf.mxu0 }
 0x106   : > { %v1580_v18 = vpop.f32.mrf.mxu3  ;;  %2803 = vmatmul.msk.bf16.gmra.mxu2 %vm841_vm4, %v3811_v10  ;;  %v1130_v39 = vpop.f32.mrf.mxu1 }
 0x107   : > { %v1659_v15 = vadd.f32 %v1580_v18, %v1525_v60  ;;  %v1131_v47 = vadd.f32 %v1130_v39, %v3708_v58  ;;  %v1356_v58 = vunpack.c.l.b16 %v1295_v50  ;;  %v1357_v18 = vunpack.c.l.b16 %v1298_v51  ;;  %v3844_v50 = vld [vmem:[%s3212_s24 + $0x84] sm:$0xff] }
 0x109   : > { %v1449_v61 = vpop.f32.mrf.mxu2  ;;  %v3822_v35 = vadd.f32 %v1736_v17, %v1659_v15  ;;  %v3837_v13 = vpack.c.b16 %v1357_v18, %v1356_v58  ;;  %v1301_v15 = vrot.slane %v3460_v30, 5 }
 0x10a   : > { %v1526_v34 = vadd.f32 %v1449_v61, %v1129_v38 }
 0x10b   : > { %2824 = vmatmul.msk.bf16.gmra.mxu3 %vm841_vm4, %v3818_v42 }
 0x10d   : > { %v1739_v31 = vpop.f32.mrf.mxu0 }
 0x10e   : > { %v1583_v54 = vpop.f32.mrf.mxu3  ;;  %v1133_v60 = vpop.f32.mrf.mxu1 }
 0x10f   : > { %v1660_v28 = vadd.f32 %v1583_v54, %v1526_v34  ;;  %v1134_v17 = vadd.f32 %v1133_v60, %v3730_v11 }
 0x110   : > { %2841 = vmatmul.msk.bf16.gmra.mxu0 %vm841_vm4, %v3435_v25 }
 0x111   : > { %v1451_v38 = vpop.f32.mrf.mxu2  ;;  %2771 = vmatmul.msk.bf16.gmra.mxu1 %vm841_vm4, %v3818_v42  ;;  %v3835_v21 = vadd.f32 %v1739_v31, %v1660_v28  ;;  %v4436_v31 = vld [vmem:[#allocation12_spill] sm:$0xff] }
 0x112   : > { %v1527_v39 = vadd.f32 %v1451_v38, %v1131_v47  ;;  %v2788_v54 = vrot.slane %v4436_v31, 9  ;;  %v1303_v47 = vrot.slane %v1301_v15, 4 }
 0x114   : > { %v1302_v49 = vsel %vm3542_vm7, %v2788_v54, %v1301_v15  ;;  %v1305_v18 = vsel %vm3542_vm7, %v1303_v47, %v1304_v46  ;;  %v3014_v54 = vld [vmem:[%s3212_s24 + $0x94] sm:$0xf] }
 0x115   : > { %v1741_v2 = vpop.f32.mrf.mxu0  ;;  %v1308_v47 = vrot.slane %v3014_v54, 5 }
 0x116   : > { %v1585_v61 = vpop.f32.mrf.mxu3  ;;  %2804 = vmatmul.msk.bf16.gmra.mxu2 %vm841_vm4, %v3837_v13  ;;  %v1135_v11 = vpop.f32.mrf.mxu1 }
 0x117   : > { %v1661_v34 = vadd.f32 %v1585_v61, %v1527_v39  ;;  %v1136_v51 = vadd.f32 %v1135_v11, %v3750_v24  ;;  %v1358_v39 = vunpack.c.l.b16 %v1302_v49  ;;  %v1359_v61 = vunpack.c.l.b16 %v1305_v18 }
 0x119   : > { %v1454_v60 = vpop.f32.mrf.mxu2  ;;  %v3848_v58 = vadd.f32 %v1741_v2, %v1661_v34  ;;  %v3863_v31 = vpack.c.b16 %v1359_v61, %v1358_v39 }
 0x11a   : > { %v1528_v30 = vadd.f32 %v1454_v60, %v1134_v17  ;;  %v4438_v17 = vld [vmem:[#allocation18_spill] sm:$0xff] }
 0x11b   : > { %4437 = vst [vmem:[#allocation12_spill] sm:$0xff] %v3848_v58  ;;  %2825 = vmatmul.msk.bf16.gmra.mxu3 %vm841_vm4, %v3844_v50 }
 0x11c   : > { %4440 = vst [vmem:[#allocation34_spill] sm:$0xff] %v3863_v31 }
 0x11d   : > { %v1744_v28 = vpop.f32.mrf.mxu0 }
 0x11e   : > { %v1588_v24 = vpop.f32.mrf.mxu3  ;;  %v1138_v38 = vpop.f32.mrf.mxu1 }
 0x11f   : > { %v1662_v11 = vadd.f32 %v1588_v24, %v1528_v30  ;;  %v1139_v2 = vadd.f32 %v1138_v38, %v3772_v7  ;;  %v3015_v30 = vld [vmem:[%s3212_s24 + $0x98] sm:$0x1]  ;;  %v3870_v38 = vld [vmem:[%s3212_s24 + $0x90] sm:$0xff] }
 0x120   : > { %2842 = vmatmul.msk.bf16.gmra.mxu0 %vm841_vm4, %v4438_v17  ;;  %v1311_v49 = vrot.slane %v3015_v30, 5  ;;  %4441 = vst [vmem:[#allocation35_spill] sm:$0xff] %v3870_v38 }
 0x121   : > { %v1456_v34 = vpop.f32.mrf.mxu2  ;;  %2772 = vmatmul.msk.bf16.gmra.mxu1 %vm841_vm4, %v3844_v50  ;;  %v3861_v15 = vadd.f32 %v1744_v28, %v1662_v11  ;;  %v3016_v28 = vld [vmem:[%s3212_s24 + $0x90] sm:$0xf] }
 0x122   : > { %v1529_v46 = vadd.f32 %v1456_v34, %v1136_v51  ;;  %v2789_v11 = vrot.slane %v3016_v28, 9  ;;  %v1310_v51 = vrot.slane %v1308_v47, 4 }
 0x123   : > { %4439 = vst [vmem:[#allocation33_spill] sm:$0xff] %v3861_v15 }
 0x124   : > { %v1309_v54 = vsel %vm3542_vm7, %v2789_v11, %v1308_v47  ;;  %v3017_v11 = vld [vmem:[%s3212_s24 + $0xa0] sm:$0xf] }
 0x125   : > { %v1746_v60 = vpop.f32.mrf.mxu0 }
 0x126   : > { %v1590_v7 = vpop.f32.mrf.mxu3  ;;  %2805 = vmatmul.msk.bf16.gmra.mxu2 %vm841_vm4, %v3863_v31  ;;  %v1140_v18 = vpop.f32.mrf.mxu1  ;;  %v3019_v31 = vld [vmem:[%s3212_s24 + $0x9c] sm:$0xf] }
 0x127   : > { %v1663_v24 = vadd.f32 %v1590_v7, %v1529_v46  ;;  %v1141_v58 = vadd.f32 %v1140_v18, %v3786_v5  ;;  %v1312_v46 = vsel %vm3542_vm7, %v1310_v51, %v1311_v49  ;;  %v1360_v18 = vunpack.c.l.b16 %v1309_v54 }
 0x128   : > { %v1361_v28 = vunpack.c.l.b16 %v1312_v46  ;;  %v1315_v51 = vrot.slane %v3017_v11, 5  ;;  %v3018_v46 = vld [vmem:[%s3212_s24 + $0xa4] sm:$0x1] }
 0x129   : > { %v1459_v39 = vpop.f32.mrf.mxu2  ;;  %v3874_v61 = vadd.f32 %v1746_v60, %v1663_v24  ;;  %v4443_v60 = vld [vmem:[#allocation6_spill] sm:$0xff] }
 0x12a   : > { %v1530_v34 = vadd.f32 %v1459_v39, %v1139_v2  ;;  %v3888_v49 = vpack.c.b16 %v1361_v28, %v1360_v18 }
 0x12b   : > { %4442 = vst [vmem:[#allocation36_spill] sm:$0xff] %v3874_v61  ;;  %2826 = vmatmul.msk.bf16.gmra.mxu3 %vm841_vm4, %v3870_v38 }
 0x12c   : > { %4445 = vst [vmem:[#allocation38_spill] sm:$0xff] %v3888_v49 }
 0x12d   : > { %v1749_v30 = vpop.f32.mrf.mxu0 }
 0x12e   : > { %v1593_v7 = vpop.f32.mrf.mxu3  ;;  %v1143_v5 = vpop.f32.mrf.mxu1 }
 0x12f   : > { %v1664_v15 = vadd.f32 %v1593_v7, %v1530_v34  ;;  %v1318_v7 = vrot.slane %v3018_v46, 5 }
 0x130   : > { %2843 = vmatmul.msk.bf16.gmra.mxu0 %vm841_vm4, %v4443_v60  ;;  %v3895_v60 = vld [vmem:[%s3212_s24 + $0x9c] sm:$0xff] }
 0x131   : > { %v1461_v2 = vpop.f32.mrf.mxu2  ;;  %2773 = vmatmul.msk.bf16.gmra.mxu1 %vm841_vm4, %v3870_v38  ;;  %v3886_v47 = vadd.f32 %v1749_v30, %v1664_v15  ;;  %4446 = vst [vmem:[#allocation39_spill] sm:$0xff] %v3895_v60  ;;  %v2790_v38 = vrot.slane %v3019_v31, 9  ;;  %v1317_v15 = vrot.slane %v1315_v51, 4 }
 0x132   : > { %v1531_v24 = vadd.f32 %v1461_v2, %v1141_v58  ;;  %v1144_v58 = vadd.f32 %v1143_v5, %v3625_v22  ;;  %v4448_v5 = vld [vmem:[#allocation7_spill] sm:$0xff] }
 0x133   : > { %4444 = vst [vmem:[#allocation37_spill] sm:$0xff] %v3886_v47  ;;  %v1316_v2 = vsel %vm3542_vm7, %v2790_v38, %v1315_v51 }
 0x134   : > { %v1362_v31 = vunpack.c.l.b16 %v1316_v2 }
 0x135   : > { %v1751_v39 = vpop.f32.mrf.mxu0 }
 0x136   : > { %v1595_v54 = vpop.f32.mrf.mxu3  ;;  %2806 = vmatmul.msk.bf16.gmra.mxu2 %vm841_vm4, %v3888_v49  ;;  %v1145_v34 = vpop.f32.mrf.mxu1 }
 0x137   : > { %v1665_v61 = vadd.f32 %v1595_v54, %v1531_v24  ;;  %v1319_v24 = vsel %vm3542_vm7, %v1317_v15, %v1318_v7  ;;  %v4451_v15 = vld [vmem:[#allocation9_spill] sm:$0xff] }
 0x138   : > { %v1363_v47 = vunpack.c.l.b16 %v1319_v24  ;;  %v4452_v24 = vld [vmem:[#allocation10_spill] sm:$0xff] }
 0x139   : > { %v1464_v30 = vpop.f32.mrf.mxu2  ;;  %v3899_v18 = vadd.f32 %v1751_v39, %v1665_v61  ;;  %v1146_v61 = vadd.f32 %v1145_v34, %v3640_v43  ;;  %v1325_v43 = vrot.slane %v4452_v24, 5 }
 0x13a   : > { %v1532_v28 = vadd.f32 %v1464_v30, %v1144_v58  ;;  %v3914_v7 = vpack.c.b16 %v1363_v47, %v1362_v31  ;;  %v1322_v58 = vrot.slane %v4451_v15, 5 }
 0x13b   : > { %4447 = vst [vmem:[#allocation40_spill] sm:$0xff] %v3899_v18  ;;  %2827 = vmatmul.msk.bf16.gmra.mxu3 %vm841_vm4, %v3895_v60  ;;  %v4454_v18 = vld [vmem:[#allocation8_spill] sm:$0xff] }
 0x13c   : > { %4450 = vst [vmem:[#allocation42_spill] sm:$0xff] %v3914_v7 }
 0x13d   : > { %v1754_v11 = vpop.f32.mrf.mxu0 }
 0x13e   : > { %v1598_v54 = vpop.f32.mrf.mxu3  ;;  %v1148_v46 = vpop.f32.mrf.mxu1 }
 0x13f   : > { %v1666_v22 = vadd.f32 %v1598_v54, %v1532_v28  ;;  %v3921_v54 = vld [vmem:[%s3212_s24 + $0xa8] sm:$0xff]  ;;  %v1149_v47 = vadd.f32 %v1148_v46, %v3660_v9 }
 0x140   : > { %2844 = vmatmul.msk.bf16.gmra.mxu0 %vm841_vm4, %v4448_v5  ;;  %4453 = vst [vmem:[#allocation9_spill] sm:$0xff] %v3921_v54 }
 0x141   : > { %v1466_v39 = vpop.f32.mrf.mxu2  ;;  %2774 = vmatmul.msk.bf16.gmra.mxu1 %vm841_vm4, %v3895_v60  ;;  %v3912_v38 = vadd.f32 %v1754_v11, %v1666_v22  ;;  %v2791_v11 = vrot.slane %v4454_v18, 9  ;;  %v1324_v22 = vrot.slane %v1322_v58, 4 }
 0x142   : > { %v1533_v51 = vadd.f32 %v1466_v39, %v1146_v61 }
 0x143   : > { %4449 = vst [vmem:[#allocation41_spill] sm:$0xff] %v3912_v38  ;;  %v1323_v15 = vsel %vm3542_vm7, %v2791_v11, %v1322_v58 }
 0x144   : > { %v1364_v38 = vunpack.c.l.b16 %v1323_v15 }
 0x145   : > { %v1756_v30 = vpop.f32.mrf.mxu0 }
 0x146   : > { %v1600_v2 = vpop.f32.mrf.mxu3  ;;  %2807 = vmatmul.msk.bf16.gmra.mxu2 %vm841_vm4, %v3914_v7  ;;  %v1150_v28 = vpop.f32.mrf.mxu1 }
 0x147   : > { %v1667_v34 = vadd.f32 %v1600_v2, %v1533_v51  ;;  %v1326_v51 = vsel %vm3542_vm7, %v1324_v22, %v1325_v43  ;;  %v1151_v58 = vadd.f32 %v1150_v28, %v3678_v29 }
 0x148   : > { %v1365_v9 = vunpack.c.l.b16 %v1326_v51 }
 0x149   : > { %v1469_v31 = vpop.f32.mrf.mxu2  ;;  %v3925_v61 = vadd.f32 %v1756_v30, %v1667_v34  ;;  %v4456_v30 = vld [vmem:[#allocation13_spill] sm:$0xff] }
 0x14a   : > { %v1534_v39 = vadd.f32 %v1469_v31, %v1149_v47  ;;  %v3946_v34 = vld [vmem:[%s3938_s21] sm:$0xf]  ;;  %v3950_v47 = vpack.c.b16 %v1365_v9, %v1364_v38  ;;  %v3953_v31 = vld [vmem:[%s3938_s21 + $0x4] sm:$0xf] }
 0x14b   : > { %4455 = vst [vmem:[#allocation10_spill] sm:$0xff] %v3925_v61  ;;  %2828 = vmatmul.msk.bf16.gmra.mxu3 %vm841_vm4, %v3921_v54  ;;  %v1691_v51 = vshrl.u32 %v3946_v34, 16  ;;  %v1694_v29 = vshll.u32 %v3946_v34, 16  ;;  %v1700_v28 = vshll.u32 %v3953_v31, 16  ;;  %v1704_v61 = vshrl.u32 %v3953_v31, 16 }
 0x14c   : > { %4457 = vst [vmem:[#allocation8_spill] sm:$0xff] %v3946_v34 }
 0x14d   : > { %v1759_v2 = vpop.f32.mrf.mxu0  ;;  %4459 = vst [vmem:[#allocation44_spill] sm:$0xff] %v3950_v47  ;;  %v1696_v5 = vrot.slane %v1694_v29, 5  ;;  %v1706_v60 = vrot.slane %v1704_v61, 4 }
 0x14e   : > { %v1603_v18 = vpop.f32.mrf.mxu3  ;;  %v1153_v24 = vpop.f32.mrf.mxu1  ;;  %4460 = vst [vmem:[#allocation45_spill] sm:$0xff] %v3953_v31  ;;  %v1702_v31 = vrot.slane %v1700_v28, 5 }
 0x14f   : > { %v1668_v46 = vadd.f32 %v1603_v18, %v1534_v39  ;;  %v4461_v39 = vld [vmem:[#allocation15_spill] sm:$0xff]  ;;  %v1154_v34 = vadd.f32 %v1153_v24, %v3698_v48 }
 0x150   : > { %2845 = vmatmul.msk.bf16.gmra.mxu0 %vm841_vm4, %v4456_v30  ;;  %v1329_v15 = vrot.slane %v4461_v39, 5 }
 0x151   : > { %v1471_v43 = vpop.f32.mrf.mxu2  ;;  %2775 = vmatmul.msk.bf16.gmra.mxu1 %vm841_vm4, %v3921_v54  ;;  %v3948_v11 = vadd.f32 %v1759_v2, %v1668_v46  ;;  %v4462_v2 = vld [vmem:[#allocation16_spill] sm:$0xff]  ;;  %v1693_v54 = vrot.slane %v1691_v51, 4  ;;  %v1707_v51 = vor.u32 %v1706_v60, %v1702_v31 }
 0x152   : > { %v1535_v22 = vadd.f32 %v1471_v43, %v1151_v58  ;;  %v1332_v9 = vrot.slane %v4462_v2, 5  ;;  %v3964_v58 = vld [vmem:[%s3212_s24 + $0xb4] sm:$0xff]  ;;  %v4463_v43 = vld [vmem:[#allocation14_spill] sm:$0xff]  ;;  %s2677_s24 = sshll.u32 %s301_s7, 8 }
 0x153   : > { %4458 = vst [vmem:[#allocation43_spill] sm:$0xff] %v3948_v11  ;;  %v2792_v39 = vrot.slane %v4463_v43, 9  ;;  %v1331_v11 = vrot.slane %v1329_v15, 4  ;;  %v1697_v24 = vor.u32 %v1696_v5, %v1693_v54  ;;  %v1708_v5 = vrot.slane %v1707_v51, 4  ;;  %s4147_s26 = scalar_lea.vmem [#allocation2], %s2677_s24 }
 0x154   : > { %s2533_s8 = sshll.u32 %s4147_s26, 4  ;;  %s2534_s8 = int_to_ptr.vmem [resolvable:$true] %s2533_s8 }
 0x155   : > { %v1761_v18 = vpop.f32.mrf.mxu0 }
 0x156   : > { %v1605_v30 = vpop.f32.mrf.mxu3  ;;  %2808 = vmatmul.msk.bf16.gmra.mxu2 %vm841_vm4, %v3950_v47  ;;  %v1155_v38 = vpop.f32.mrf.mxu1  ;;  %v3971_v47 = vld [vmem:[%s3938_s21 + $0x8] sm:$0x1] }
 0x157   : > { %v1669_v46 = vadd.f32 %v1605_v30, %v1535_v22  ;;  %v1330_v30 = vsel %vm3542_vm7, %v2792_v39, %v1329_v15  ;;  %v1333_v22 = vsel %vm3542_vm7, %v1331_v11, %v1332_v9  ;;  %v1710_v29 = vshll.u32 %v3971_v47, 16 }
 0x158   : > { %v1366_v28 = vunpack.c.l.b16 %v1330_v30  ;;  %v1156_v2 = vadd.f32 %v1155_v38, %v3719_v63  ;;  %v1698_v11 = vrot.slane %v1697_v24, 4 }
 0x159   : > { %v1474_v7 = vpop.f32.mrf.mxu2  ;;  %v3968_v49 = vadd.f32 %v1761_v18, %v1669_v46  ;;  %v1712_v60 = vrot.slane %v1710_v29, 5 }
 0x15a   : > { %v1536_v17 = vadd.f32 %v1474_v7, %v1154_v34  ;;  %v1367_v7 = vunpack.c.l.b16 %v1333_v22  ;;  %v3996_v22 = vld [vmem:[%s3938_s21] sm:$0xff] }
 0x15b   : > { %2829 = vmatmul.msk.bf16.gmra.mxu3 %vm841_vm4, %v3964_v58  ;;  %v1713_v63 = vsel %vm3239_vm3, %v1708_v5, %v1712_v60 }
 0x15c   : > { %v3987_v46 = vpack.c.b16 %v1367_v7, %v1366_v28  ;;  %v1717_v51 = vunpack.c.l.b16 %v1713_v63 }
 0x15d   : > { %v1764_v48 = vpop.f32.mrf.mxu0 }
 0x15e   : > { %v1608_v61 = vpop.f32.mrf.mxu3  ;;  %v1158_v18 = vpop.f32.mrf.mxu1 }
 0x15f   : > { %v1670_v34 = vadd.f32 %v1608_v61, %v1536_v17  ;;  %v1703_v17 = vsel %vm3239_vm3, %v1698_v11, %v1702_v31 }
 0x160   : > { %2846 = vmatmul.msk.bf16.gmra.mxu0 %vm841_vm4, %v3551_v53  ;;  %v1716_v24 = vunpack.c.l.b16 %v1703_v17 }
 0x161   : > { %v1476_v15 = vpop.f32.mrf.mxu2  ;;  %2776 = vmatmul.msk.bf16.gmra.mxu1 %vm841_vm4, %v3964_v58  ;;  %v3985_v54 = vadd.f32 %v1764_v48, %v1670_v34  ;;  %v1159_v48 = vadd.f32 %v1158_v18, %v3740_v26 }
 0x162   : > { %v1537_v9 = vadd.f32 %v1476_v15, %v1156_v2  ;;  %v4003_v31 = vpack.c.b16 %v1717_v51, %v1716_v24 }
 0x165   : > { %v1766_v43 = vpop.f32.mrf.mxu0 }
 0x166   : > { %v1610_v38 = vpop.f32.mrf.mxu3  ;;  %2809 = vmatmul.msk.bf16.gmra.mxu2 %vm841_vm4, %v3987_v46  ;;  %v1160_v39 = vpop.f32.mrf.mxu1 }
 0x167   : > { %v1671_v30 = vadd.f32 %v1610_v38, %v1537_v9  ;;  %v1161_v26 = vadd.f32 %v1160_v39, %v3757_v0 }
 0x169   : > { %v1479_v29 = vpop.f32.mrf.mxu2  ;;  %v3999_v61 = vadd.f32 %v1766_v43, %v1671_v30 }
 0x16a   : > { %v1538_v28 = vadd.f32 %v1479_v29, %v1159_v48 }
 0x16b   : > { %2830 = vmatmul.msk.bf16.gmra.mxu3 %vm841_vm4, %v3996_v22 }
 0x16d   : > { %v1769_v7 = vpop.f32.mrf.mxu0 }
 0x16e   : > { %v1613_v34 = vpop.f32.mrf.mxu3  ;;  %v1163_v2 = vpop.f32.mrf.mxu1 }
 0x16f   : > { %v1672_v15 = vadd.f32 %v1613_v34, %v1538_v28  ;;  %v1164_v63 = vadd.f32 %v1163_v2, %v3642_v16 }
 0x170   : > { %2847 = vmatmul.msk.bf16.gmra.mxu0 %vm841_vm4, %v4003_v31 }
 0x171   : > { %v1481_v18 = vpop.f32.mrf.mxu2  ;;  %2850 = vmatmul.msk.bf16.vlgmr.msra.gmra.mxu1 %vm841_vm4, %v3576_v55  ;;  %v4010_v11 = vadd.f32 %v1769_v7, %v1672_v15 }
 0x172   : > { %v1539_v5 = vadd.f32 %v1481_v18, %v1161_v26 }
 0x175   : > { %v1771_v60 = vpop.f32.mrf.mxu0 }
 0x176   : > { %v1615_v9 = vpop.f32.mrf.mxu3  ;;  %2871 = vmatmul.msk.bf16.vlgmr.msra.gmra.mxu2 %vm841_vm4, %v3588_v6  ;;  %v1165_v43 = vpop.f32.mrf.mxu1 }
 0x177   : > { %v1673_v17 = vadd.f32 %v1615_v9, %v1539_v5  ;;  %v1166_v6 = vadd.f32 %v1165_v43, %v3664_v57 }
 0x179   : > { %v1484_v38 = vpop.f32.mrf.mxu2  ;;  %v4015_v30 = vadd.f32 %v1771_v60, %v1673_v17 }
 0x17a   : > { %v1540_v0 = vadd.f32 %v1484_v38, %v1164_v63 }
 0x17b   : > { %2888 = vmatmul.msk.bf16.vlgmr.msra.gmra.mxu3 %vm841_vm4, %v3479_v45 }
 0x17d   : > { %v1774_v55 = vpop.f32.mrf.mxu0 }
 0x17e   : > { %v1618_v39 = vpop.f32.mrf.mxu3  ;;  %v1168_v48 = vpop.f32.mrf.mxu1 }
 0x17f   : > { %v1674_v24 = vadd.f32 %v1618_v39, %v1540_v0  ;;  %v1169_v2 = vadd.f32 %v1168_v48, %v3684_v59 }
 0x180   : > { %2906 = vmatmul.msk.bf16.vlgmr.msra.gmra.mxu0 %vm841_vm4, %v3602_v52 }
 0x181   : > { %v1486_v51 = vpop.f32.mrf.mxu2  ;;  %2851 = vmatmul.msk.bf16.gmra.mxu1 %vm841_vm4, %v3602_v52  ;;  %v4024_v16 = vadd.f32 %v1774_v55, %v1674_v24 }
 0x182   : > { %v1541_v29 = vadd.f32 %v1486_v51, %v1166_v6 }
 0x185   : > { %v1776_v28 = vpop.f32.mrf.mxu0 }
 0x186   : > { %v1620_v7 = vpop.f32.mrf.mxu3  ;;  %2872 = vmatmul.msk.bf16.gmra.mxu2 %vm841_vm4, %v3608_v41  ;;  %v1170_v45 = vpop.f32.mrf.mxu1 }
 0x187   : > { %v1675_v34 = vadd.f32 %v1620_v7, %v1541_v29  ;;  %v1171_v41 = vadd.f32 %v1170_v45, %v3702_v3 }
 0x189   : > { %v1489_v15 = vpop.f32.mrf.mxu2  ;;  %v4029_v26 = vadd.f32 %v1776_v28, %v1675_v34 }
 0x18a   : > { %v1542_v57 = vadd.f32 %v1489_v15, %v1169_v2 }
 0x18b   : > { %2889 = vmatmul.msk.bf16.gmra.mxu3 %vm841_vm4, %v3569_v20 }
 0x18d   : > { %v1779_v52 = vpop.f32.mrf.mxu0 }
 0x18e   : > { %v1623_v18 = vpop.f32.mrf.mxu3  ;;  %v1173_v5 = vpop.f32.mrf.mxu1 }
 0x18f   : > { %v1676_v60 = vadd.f32 %v1623_v18, %v1542_v57  ;;  %v1174_v0 = vadd.f32 %v1173_v5, %v3721_v23 }
 0x190   : > { %2907 = vmatmul.msk.bf16.gmra.mxu0 %vm841_vm4, %v3622_v40 }
 0x191   : > { %v1491_v9 = vpop.f32.mrf.mxu2  ;;  %2852 = vmatmul.msk.bf16.gmra.mxu1 %vm841_vm4, %v3622_v40  ;;  %v4038_v59 = vadd.f32 %v1779_v52, %v1676_v60 }
 0x192   : > { %v1543_v43 = vadd.f32 %v1491_v9, %v1171_v41 }
 0x195   : > { %v1781_v17 = vpop.f32.mrf.mxu0 }
 0x196   : > { %v1625_v63 = vpop.f32.mrf.mxu3  ;;  %2873 = vmatmul.msk.bf16.gmra.mxu2 %vm841_vm4, %v3630_v8  ;;  %v1175_v20 = vpop.f32.mrf.mxu1 }
 0x197   : > { %v1677_v38 = vadd.f32 %v1625_v63, %v1543_v43  ;;  %v1176_v8 = vadd.f32 %v1175_v20, %v3742_v1  ;;  %v4464_v43 = vld [vmem:[#allocation21_spill] sm:$0xff]  ;;  %v4465_v63 = vld [vmem:[#allocation19_spill] sm:$0xff] }
 0x199   : > { %v1494_v55 = vpop.f32.mrf.mxu2  ;;  %v4043_v39 = vadd.f32 %v1781_v17, %v1677_v38 }
 0x19a   : > { %v1544_v3 = vadd.f32 %v1494_v55, %v1174_v0  ;;  %v4466_v55 = vld [vmem:[#allocation11_spill] sm:$0xff] }
 0x19b   : > { %2890 = vmatmul.msk.bf16.gmra.mxu3 %vm841_vm4, %v3251_v62 }
 0x19d   : > { %v1784_v40 = vpop.f32.mrf.mxu0 }
 0x19e   : > { %v1628_v48 = vpop.f32.mrf.mxu3  ;;  %v1178_v24 = vpop.f32.mrf.mxu1 }
 0x19f   : > { %v1678_v6 = vadd.f32 %v1628_v48, %v1544_v3  ;;  %v1179_v34 = vadd.f32 %v1178_v24, %v3764_v56  ;;  %v4467_v24 = vld [vmem:[#allocation24_spill] sm:$0xff] }
 0x1a0   : > { %2908 = vmatmul.msk.bf16.gmra.mxu0 %vm841_vm4, %v3650_v12 }
 0x1a1   : > { %v1496_v51 = vpop.f32.mrf.mxu2  ;;  %2853 = vmatmul.msk.bf16.gmra.mxu1 %vm841_vm4, %v3650_v12  ;;  %v4052_v23 = vadd.f32 %v1784_v40, %v1678_v6  ;;  %v4468_v6 = vld [vmem:[#allocation20_spill] sm:$0xff] }
 0x1a2   : > { %v1545_v29 = vadd.f32 %v1496_v51, %v1176_v8 }
 0x1a5   : > { %v1786_v28 = vpop.f32.mrf.mxu0 }
 0x1a6   : > { %v1630_v7 = vpop.f32.mrf.mxu3  ;;  %2874 = vmatmul.msk.bf16.gmra.mxu2 %vm841_vm4, %v3658_v27  ;;  %v1180_v62 = vpop.f32.mrf.mxu1 }
 0x1a7   : > { %v1679_v45 = vadd.f32 %v1630_v7, %v1545_v29  ;;  %v1181_v27 = vadd.f32 %v1180_v62, %v3779_v44 }
 0x1a9   : > { %v1499_v2 = vpop.f32.mrf.mxu2  ;;  %v4057_v15 = vadd.f32 %v1786_v28, %v1679_v45  ;;  %v4469_v45 = vld [vmem:[#allocation25_spill] sm:$0xff] }
 0x1aa   : > { %v1546_v1 = vadd.f32 %v1499_v2, %v1179_v34 }
 0x1ab   : > { %2891 = vmatmul.msk.bf16.gmra.mxu3 %vm841_vm4, %v3325_v37 }
 0x1ad   : > { %v1789_v12 = vpop.f32.mrf.mxu0 }
 0x1ae   : > { %v1633_v57 = vpop.f32.mrf.mxu3  ;;  %v1183_v52 = vpop.f32.mrf.mxu1 }
 0x1af   : > { %v1680_v18 = vadd.f32 %v1633_v57, %v1546_v1  ;;  %v1184_v20 = vadd.f32 %v1183_v52, %v4465_v63  ;;  %v4470_v1 = vld [vmem:[#allocation22_spill] sm:$0xff] }
 0x1b0   : > { %2909 = vmatmul.msk.bf16.gmra.mxu0 %vm841_vm4, %v3682_v33 }
 0x1b1   : > { %v1501_v5 = vpop.f32.mrf.mxu2  ;;  %2854 = vmatmul.msk.bf16.gmra.mxu1 %vm841_vm4, %v3682_v33  ;;  %v4066_v56 = vadd.f32 %v1789_v12, %v1680_v18 }
 0x1b2   : > { %v1547_v60 = vadd.f32 %v1501_v5, %v1181_v27  ;;  %v4471_v27 = vld [vmem:[#allocation17_spill] sm:$0xff] }
 0x1b5   : > { %v1791_v41 = vpop.f32.mrf.mxu0 }
 0x1b6   : > { %v1635_v9 = vpop.f32.mrf.mxu3  ;;  %2875 = vmatmul.msk.bf16.gmra.mxu2 %vm841_vm4, %v4464_v43  ;;  %v1185_v37 = vpop.f32.mrf.mxu1  ;;  %v4472_v43 = vld [vmem:[#allocation27_spill] sm:$0xff] }
 0x1b7   : > { %v1681_v17 = vadd.f32 %v1635_v9, %v1547_v60  ;;  %v1186_v8 = vadd.f32 %v1185_v37, %v4468_v6  ;;  %v4473_v37 = vld [vmem:[#allocation23_spill] sm:$0xff] }
 0x1b9   : > { %v1504_v38 = vpop.f32.mrf.mxu2  ;;  %v4071_v0 = vadd.f32 %v1791_v41, %v1681_v17 }
 0x1ba   : > { %v1548_v44 = vadd.f32 %v1504_v38, %v1184_v20 }
 0x1bb   : > { %2892 = vmatmul.msk.bf16.gmra.mxu3 %vm841_vm4, %v4466_v55 }
 0x1bd   : > { %v1794_v33 = vpop.f32.mrf.mxu0 }
 0x1be   : > { %v1638_v3 = vpop.f32.mrf.mxu3  ;;  %v1188_v40 = vpop.f32.mrf.mxu1 }
 0x1bf   : > { %v1682_v48 = vadd.f32 %v1638_v3, %v1548_v44  ;;  %v1189_v12 = vadd.f32 %v1188_v40, %v4470_v1  ;;  %v4478_v1 = vld [vmem:[#allocation28_spill] sm:$0xff] }
 0x1c0   : > { %2910 = vmatmul.msk.bf16.gmra.mxu0 %vm841_vm4, %v4467_v24 }
 0x1c1   : > { %v1506_v51 = vpop.f32.mrf.mxu2  ;;  %2855 = vmatmul.msk.bf16.gmra.mxu1 %vm841_vm4, %v4467_v24  ;;  %v4080_v29 = vadd.f32 %v1794_v33, %v1682_v48  ;;  %v4474_v33 = vld [vmem:[#allocation29_spill] sm:$0xff]  ;;  %v4475_v48 = vld [vmem:[#allocation26_spill] sm:$0xff] }
 0x1c2   : > { %v1549_v28 = vadd.f32 %v1506_v51, %v1186_v8 }
 0x1c5   : > { %v1796_v7 = vpop.f32.mrf.mxu0 }
 0x1c6   : > { %v1640_v62 = vpop.f32.mrf.mxu3  ;;  %2876 = vmatmul.msk.bf16.gmra.mxu2 %vm841_vm4, %v4469_v45  ;;  %v1190_v34 = vpop.f32.mrf.mxu1 }
 0x1c7   : > { %v1683_v2 = vadd.f32 %v1640_v62, %v1549_v28  ;;  %v1191_v17 = vadd.f32 %v1190_v34, %v4473_v37  ;;  %v4476_v28 = vld [vmem:[#allocation5_spill] sm:$0xff] }
 0x1c9   : > { %v1509_v57 = vpop.f32.mrf.mxu2  ;;  %v4085_v52 = vadd.f32 %v1796_v7, %v1683_v2  ;;  %v4477_v2 = vld [vmem:[#allocation31_spill] sm:$0xff] }
 0x1ca   : > { %v1550_v18 = vadd.f32 %v1509_v57, %v1189_v12 }
 0x1cb   : > { %2893 = vmatmul.msk.bf16.gmra.mxu3 %vm841_vm4, %v4471_v27 }
 0x1cd   : > { %v1799_v5 = vpop.f32.mrf.mxu0 }
 0x1ce   : > { %v1643_v60 = vpop.f32.mrf.mxu3  ;;  %v1193_v41 = vpop.f32.mrf.mxu1 }
 0x1cf   : > { %v1684_v9 = vadd.f32 %v1643_v60, %v1550_v18  ;;  %v1194_v24 = vadd.f32 %v1193_v41, %v4475_v48 }
 0x1d0   : > { %2911 = vmatmul.msk.bf16.gmra.mxu0 %vm841_vm4, %v4472_v43 }
 0x1d1   : > { %v1511_v63 = vpop.f32.mrf.mxu2  ;;  %2856 = vmatmul.msk.bf16.gmra.mxu1 %vm841_vm4, %v4472_v43  ;;  %v4094_v20 = vadd.f32 %v1799_v5, %v1684_v9  ;;  %v4479_v43 = vld [vmem:[#allocation30_spill] sm:$0xff] }
 0x1d2   : > { %v1551_v38 = vadd.f32 %v1511_v63, %v1191_v17 }
 0x1d5   : > { %v1801_v44 = vpop.f32.mrf.mxu0 }
 0x1d6   : > { %v1645_v55 = vpop.f32.mrf.mxu3  ;;  %2877 = vmatmul.msk.bf16.gmra.mxu2 %vm841_vm4, %v4474_v33  ;;  %v1195_v3 = vpop.f32.mrf.mxu1 }
 0x1d7   : > { %v1685_v40 = vadd.f32 %v1645_v55, %v1551_v38  ;;  %v1196_v12 = vadd.f32 %v1195_v3, %v4478_v1 }
 0x1d9   : > { %v1514_v6 = vpop.f32.mrf.mxu2  ;;  %v4099_v8 = vadd.f32 %v1801_v44, %v1685_v40  ;;  %v4480_v40 = vld [vmem:[#allocation32_spill] sm:$0xff] }
 0x1da   : > { %v1552_v51 = vadd.f32 %v1514_v6, %v1194_v24 }
 0x1db   : > { %2894 = vmatmul.msk.bf16.gmra.mxu3 %vm841_vm4, %v4476_v28 }
 0x1dd   : > { %v1804_v7 = vpop.f32.mrf.mxu0 }
 0x1de   : > { %v1648_v62 = vpop.f32.mrf.mxu3  ;;  %v1198_v45 = vpop.f32.mrf.mxu1 }
 0x1df   : > { %v1686_v34 = vadd.f32 %v1648_v62, %v1552_v51  ;;  %v1199_v37 = vadd.f32 %v1198_v45, %v4479_v43 }
 0x1e0   : > { %2912 = vmatmul.msk.bf16.gmra.mxu0 %vm841_vm4, %v4477_v2 }
 0x1e1   : > { %v1516_v57 = vpop.f32.mrf.mxu2  ;;  %2857 = vmatmul.msk.bf16.gmra.mxu1 %vm841_vm4, %v4477_v2  ;;  %v4108_v18 = vadd.f32 %v1804_v7, %v1686_v34 }
 0x1e2   : > { %v1553_v27 = vadd.f32 %v1516_v57, %v1196_v12 }
 0x1e5   : > { %v1806_v5 = vpop.f32.mrf.mxu0 }
 0x1e6   : > { %v1650_v60 = vpop.f32.mrf.mxu3  ;;  %2878 = vmatmul.msk.bf16.gmra.mxu2 %vm841_vm4, %v3794_v19  ;;  %v1200_v41 = vpop.f32.mrf.mxu1 }
 0x1e7   : > { %v1687_v9 = vadd.f32 %v1650_v60, %v1553_v27  ;;  %v1201_v19 = vadd.f32 %v1200_v41, %v4480_v40 }
 0x1e9   : > { %v1519_v17 = vpop.f32.mrf.mxu2  ;;  %v4113_v63 = vadd.f32 %v1806_v5, %v1687_v9 }
 0x1ea   : > { %v1554_v38 = vadd.f32 %v1519_v17, %v1199_v37 }
 0x1eb   : > { %2895 = vmatmul.msk.bf16.gmra.mxu3 %vm841_vm4, %v3350_v4 }
 0x1ed   : > { %v1809_v44 = vpop.f32.mrf.mxu0 }
 0x1ee   : > { %v1653_v55 = vpop.f32.mrf.mxu3  ;;  %v1874_v33 = vpop.f32.mrf.mxu1 }
 0x1ef   : > { %v1688_v3 = vadd.f32 %v1653_v55, %v1554_v38  ;;  %v1954_v62 = vadd.f32 %v1874_v33, %v3809_v32  ;;  %v4481_v55 = vld [vmem:[#allocation18_spill] sm:$0xff] }
 0x1f0   : > { %2913 = vmatmul.msk.bf16.gmra.mxu0 %vm841_vm4, %v3811_v10 }
 0x1f1   : > { %v1521_v48 = vpop.f32.mrf.mxu2  ;;  %2858 = vmatmul.msk.bf16.gmra.mxu1 %vm841_vm4, %v3811_v10  ;;  %v4122_v24 = vadd.f32 %v1809_v44, %v1688_v3 }
 0x1f2   : > { %v1555_v6 = vadd.f32 %v1521_v48, %v1201_v19 }
 0x1f5   : > { %v1811_v51 = vpop.f32.mrf.mxu0 }
 0x1f6   : > { %v1655_v28 = vpop.f32.mrf.mxu3  ;;  %2879 = vmatmul.msk.bf16.gmra.mxu2 %vm841_vm4, %v3818_v42  ;;  %v1876_v4 = vpop.f32.mrf.mxu1  ;;  %v4135_v42 = vld [vmem:[%s4360_s3] ss:$0 sm:$0xff] }
 0x1f7   : > { %v1689_v7 = vadd.f32 %v1655_v28, %v1555_v6  ;;  %v1955_v27 = vadd.f32 %v1876_v4, %v3822_v35  ;;  %v4482_v6 = vld [vmem:[#allocation34_spill] sm:$0xff]  ;;  %v4483_v28 = vld [vmem:[#allocation12_spill] sm:$0xff] }
 0x1f9   : > { %v2008_v45 = vpop.f32.mrf.mxu2  ;;  %v4127_v34 = vadd.f32 %v1811_v51, %v1689_v7 }
 0x1fa   : > { %v2088_v10 = vadd.f32 %v2008_v45, %v1954_v62 }
 0x1fb   : > { %2896 = vmatmul.msk.bf16.gmra.mxu3 %vm841_vm4, %v3435_v25 }
 0x1fd   : > { %v2304_v2 = vpop.f32.mrf.mxu0 }
 0x1fe   : > { %v2164_v1 = vpop.f32.mrf.mxu3  ;;  %v1879_v12 = vpop.f32.mrf.mxu1 }
 0x1ff   : > { %v2244_v57 = vadd.f32 %v2164_v1, %v2088_v10  ;;  %v1956_v38 = vadd.f32 %v1879_v12, %v3835_v21  ;;  %v4484_v1 = vld [vmem:[#allocation35_spill] sm:$0xff] }
 0x200   : > { %2914 = vmatmul.msk.bf16.gmra.mxu0 %vm841_vm4, %v3837_v13 }
 0x201   : > { %v2384_v32 = vadd.f32 %v2304_v2, %v2244_v57  ;;  %v2010_v25 = vpop.f32.mrf.mxu2  ;;  %2859 = vmatmul.msk.bf16.gmra.mxu1 %vm841_vm4, %v3837_v13 }
 0x202   : > { %v2089_v60 = vadd.f32 %v2010_v25, %v1955_v27  ;;  %v4485_v27 = vld [vmem:[#allocation33_spill] sm:$0xff] }
 0x203   : > { %v2420_v5 = vadd.f32 %v4135_v42, %v2384_v32 }
 0x205   : > { %v2452_v41 = vmul.f32 0.23570226, %v2420_v5  ;;  %v2306_v9 = vpop.f32.mrf.mxu0 }
 0x206   : > { %v2166_v43 = vpop.f32.mrf.mxu3  ;;  %2880 = vmatmul.msk.bf16.gmra.mxu2 %vm841_vm4, %v3844_v50  ;;  %v1881_v37 = vpop.f32.mrf.mxu1 }
 0x207   : > { %2484 = vst [vmem:[%s4147_s26] sm:$0xff] %v2452_v41  ;;  %v2245_v35 = vadd.f32 %v2166_v43, %v2089_v60  ;;  %v1957_v21 = vadd.f32 %v1881_v37, %v4483_v28  ;;  %v4486_v41 = vld [vmem:[#allocation6_spill] sm:$0xff] }
 0x209   : > { %v2385_v17 = vadd.f32 %v2306_v9, %v2245_v35  ;;  %v2013_v13 = vpop.f32.mrf.mxu2 }
 0x20a   : > { %v2090_v33 = vadd.f32 %v2013_v13, %v1956_v38  ;;  %v4487_v13 = vld [vmem:[#allocation38_spill] sm:$0xff] }
 0x20b   : > { %v2421_v44 = vadd.f32 %v4135_v42, %v2385_v17  ;;  %2897 = vmatmul.msk.bf16.gmra.mxu3 %vm841_vm4, %v4481_v55  ;;  %v4488_v55 = vld [vmem:[#allocation36_spill] sm:$0xff] }
 0x20d   : > { %v2453_v3 = vmul.f32 0.23570226, %v2421_v44  ;;  %v2309_v40 = vpop.f32.mrf.mxu0 }
 0x20e   : > { %v2169_v50 = vpop.f32.mrf.mxu3  ;;  %v1884_v19 = vpop.f32.mrf.mxu1 }
 0x20f   : > { %2485 = vst [vmem:[%s4147_s26 + $0x8] sm:$0xff] %v2453_v3  ;;  %v2246_v48 = vadd.f32 %v2169_v50, %v2090_v33  ;;  %v1958_v25 = vadd.f32 %v1884_v19, %v4485_v27 }
 0x210   : > { %2915 = vmatmul.msk.bf16.gmra.mxu0 %vm841_vm4, %v4482_v6 }
 0x211   : > { %v2386_v51 = vadd.f32 %v2309_v40, %v2246_v48  ;;  %v2015_v4 = vpop.f32.mrf.mxu2  ;;  %2860 = vmatmul.msk.bf16.gmra.mxu1 %vm841_vm4, %v4482_v6 }
 0x212   : > { %v2091_v62 = vadd.f32 %v2015_v4, %v1957_v21 }
 0x213   : > { %v2422_v7 = vadd.f32 %v4135_v42, %v2386_v51  ;;  %v4489_v51 = vld [vmem:[#allocation39_spill] sm:$0xff] }
 0x215   : > { %v2454_v45 = vmul.f32 0.23570226, %v2422_v7  ;;  %v2311_v10 = vpop.f32.mrf.mxu0  ;;  %v4490_v7 = vld [vmem:[#allocation37_spill] sm:$0xff] }
 0x216   : > { %v2171_v2 = vpop.f32.mrf.mxu3  ;;  %2881 = vmatmul.msk.bf16.gmra.mxu2 %vm841_vm4, %v4484_v1  ;;  %v1886_v12 = vpop.f32.mrf.mxu1 }
 0x217   : > { %2486 = vst [vmem:[%s4147_s26 + $0x10] sm:$0xff] %v2454_v45  ;;  %v2247_v57 = vadd.f32 %v2171_v2, %v2091_v62  ;;  %v1959_v33 = vadd.f32 %v1886_v12, %v4488_v55  ;;  %v4491_v2 = vld [vmem:[#allocation7_spill] sm:$0xff] }
 0x219   : > { %v2387_v32 = vadd.f32 %v2311_v10, %v2247_v57  ;;  %v2018_v5 = vpop.f32.mrf.mxu2 }
 0x21a   : > { %v2092_v9 = vadd.f32 %v2018_v5, %v1958_v25  ;;  %v4492_v5 = vld [vmem:[#allocation42_spill] sm:$0xff] }
 0x21b   : > { %v2423_v60 = vadd.f32 %v4135_v42, %v2387_v32  ;;  %2898 = vmatmul.msk.bf16.gmra.mxu3 %vm841_vm4, %v4486_v41  ;;  %v4493_v41 = vld [vmem:[#allocation40_spill] sm:$0xff] }
 0x21d   : > { %v2455_v43 = vmul.f32 0.23570226, %v2423_v60  ;;  %v2314_v37 = vpop.f32.mrf.mxu0 }
 0x21e   : > { %v2174_v35 = vpop.f32.mrf.mxu3  ;;  %v1889_v17 = vpop.f32.mrf.mxu1 }
 0x21f   : > { %2487 = vst [vmem:[%s4147_s26 + $0x18] sm:$0xff] %v2455_v43  ;;  %v2248_v38 = vadd.f32 %v2174_v35, %v2092_v9  ;;  %v1960_v62 = vadd.f32 %v1889_v17, %v4490_v7 }
 0x220   : > { %2916 = vmatmul.msk.bf16.gmra.mxu0 %vm841_vm4, %v4487_v13 }
 0x221   : > { %v2388_v44 = vadd.f32 %v2314_v37, %v2248_v38  ;;  %v2020_v3 = vpop.f32.mrf.mxu2  ;;  %2861 = vmatmul.msk.bf16.gmra.mxu1 %vm841_vm4, %v4487_v13 }
 0x222   : > { %v2093_v50 = vadd.f32 %v2020_v3, %v1959_v33 }
 0x223   : > { %v2424_v40 = vadd.f32 %v4135_v42, %v2388_v44  ;;  %v4494_v44 = vld [vmem:[#allocation9_spill] sm:$0xff] }
 0x225   : > { %v2456_v19 = vmul.f32 0.23570226, %v2424_v40  ;;  %v2316_v48 = vpop.f32.mrf.mxu0  ;;  %v4495_v40 = vld [vmem:[#allocation41_spill] sm:$0xff] }
 0x226   : > { %v2176_v6 = vpop.f32.mrf.mxu3  ;;  %2882 = vmatmul.msk.bf16.gmra.mxu2 %vm841_vm4, %v4489_v51  ;;  %v1891_v28 = vpop.f32.mrf.mxu1 }
 0x227   : > { %2488 = vst [vmem:[%s4147_s26 + $0x20] sm:$0xff] %v2456_v19  ;;  %v2249_v21 = vadd.f32 %v2176_v6, %v2093_v50  ;;  %v1961_v9 = vadd.f32 %v1891_v28, %v4493_v41  ;;  %v4496_v6 = vld [vmem:[#allocation13_spill] sm:$0xff] }
 0x229   : > { %v2389_v4 = vadd.f32 %v2316_v48, %v2249_v21  ;;  %v2023_v45 = vpop.f32.mrf.mxu2 }
 0x22a   : > { %v2094_v1 = vadd.f32 %v2023_v45, %v1960_v62  ;;  %v4497_v45 = vld [vmem:[#allocation44_spill] sm:$0xff] }
 0x22b   : > { %v2425_v10 = vadd.f32 %v4135_v42, %v2389_v4  ;;  %2899 = vmatmul.msk.bf16.gmra.mxu3 %vm841_vm4, %v4491_v2  ;;  %v4498_v2 = vld [vmem:[#allocation10_spill] sm:$0xff] }
 0x22d   : > { %v2457_v12 = vmul.f32 0.23570226, %v2425_v10  ;;  %v2319_v57 = vpop.f32.mrf.mxu0 }
 0x22e   : > { %v2179_v32 = vpop.f32.mrf.mxu3  ;;  %v1894_v27 = vpop.f32.mrf.mxu1 }
 0x22f   : > { %2489 = vst [vmem:[%s4147_s26 + $0x28] sm:$0xff] %v2457_v12  ;;  %v2250_v25 = vadd.f32 %v2179_v32, %v2094_v1  ;;  %v1962_v50 = vadd.f32 %v1894_v27, %v4495_v40 }
 0x230   : > { %2917 = vmatmul.msk.bf16.gmra.mxu0 %vm841_vm4, %v4492_v5 }
 0x231   : > { %v2390_v60 = vadd.f32 %v2319_v57, %v2250_v25  ;;  %v2025_v43 = vpop.f32.mrf.mxu2  ;;  %2862 = vmatmul.msk.bf16.gmra.mxu1 %vm841_vm4, %v4492_v5 }
 0x232   : > { %v2095_v35 = vadd.f32 %v2025_v43, %v1961_v9  ;;  %v4499_v43 = vld [vmem:[#allocation43_spill] sm:$0xff] }
 0x233   : > { %v2426_v37 = vadd.f32 %v4135_v42, %v2390_v60 }
 0x235   : > { %v2458_v17 = vmul.f32 0.23570226, %v2426_v37  ;;  %v2321_v38 = vpop.f32.mrf.mxu0 }
 0x236   : > { %v2181_v13 = vpop.f32.mrf.mxu3  ;;  %2883 = vmatmul.msk.bf16.gmra.mxu2 %vm841_vm4, %v4494_v44  ;;  %v1896_v55 = vpop.f32.mrf.mxu1 }
 0x237   : > { %2490 = vst [vmem:[%s4147_s26 + $0x30] sm:$0xff] %v2458_v17  ;;  %v2251_v33 = vadd.f32 %v2181_v13, %v2095_v35  ;;  %v1963_v1 = vadd.f32 %v1896_v55, %v4498_v2  ;;  %v4500_v13 = vld [vmem:[#allocation45_spill] sm:$0xff] }
 0x238   : > { %v1849_v44 = vrot.slane %v4500_v13, 5 }
 0x239   : > { %v2391_v3 = vadd.f32 %v2321_v38, %v2251_v33  ;;  %v2028_v19 = vpop.f32.mrf.mxu2 }
 0x23a   : > { %v2096_v51 = vadd.f32 %v2028_v19, %v1962_v50 }
 0x23b   : > { %v2427_v48 = vadd.f32 %v4135_v42, %v2391_v3  ;;  %2900 = vmatmul.msk.bf16.gmra.mxu3 %vm841_vm4, %v4496_v6  ;;  %v4212_v3 = vld [vmem:[%s3938_s21 + $0xc] sm:$0xf] }
 0x23d   : > { %v2459_v28 = vmul.f32 0.23570226, %v2427_v48  ;;  %v2324_v21 = vpop.f32.mrf.mxu0  ;;  %v4501_v48 = vld [vmem:[#allocation8_spill] sm:$0xff] }
 0x23e   : > { %v2184_v4 = vpop.f32.mrf.mxu3  ;;  %v1899_v7 = vpop.f32.mrf.mxu1  ;;  %v2848_v6 = vrot.slane %v4501_v48, 9 }
 0x23f   : > { %2491 = vst [vmem:[%s4147_s26 + $0x38] sm:$0xff] %v2459_v28  ;;  %v2252_v62 = vadd.f32 %v2184_v4, %v2096_v51  ;;  %v1964_v37 = vadd.f32 %v1899_v7, %v4499_v43  ;;  %v2124_v51 = vshll.u32 %v4212_v3, 16 }
 0x240   : > { %2918 = vmatmul.msk.bf16.gmra.mxu0 %vm841_vm4, %v4497_v45 }
 0x241   : > { %v2392_v10 = vadd.f32 %v2324_v21, %v2252_v62  ;;  %v2030_v12 = vpop.f32.mrf.mxu2  ;;  %2863 = vmatmul.msk.bf16.gmra.mxu1 %vm841_vm4, %v4497_v45  ;;  %v1851_v45 = vrot.slane %v1849_v44, 4 }
 0x242   : > { %v2097_v32 = vadd.f32 %v2030_v12, %v1963_v1  ;;  %v1850_v12 = vsel %vm3542_vm7, %v2848_v6, %v1849_v44 }
 0x243   : > { %v2428_v57 = vadd.f32 %v4135_v42, %v2392_v10  ;;  %v1852_v10 = vrot.slane %v3971_v47, 5  ;;  %v1856_v43 = vunpack.c.l.b16 %v1850_v12 }
 0x245   : > { %v2460_v27 = vmul.f32 0.23570226, %v2428_v57  ;;  %v2326_v25 = vpop.f32.mrf.mxu0 }
 0x246   : > { %v2186_v5 = vpop.f32.mrf.mxu3  ;;  %2884 = vmatmul.msk.bf16.gmra.mxu2 %vm841_vm4, %v3964_v58  ;;  %v1901_v60 = vpop.f32.mrf.mxu1  ;;  %v4215_v58 = vld [vmem:[%s3938_s21 + $0x10] sm:$0xf] }
 0x247   : > { %2492 = vst [vmem:[%s4147_s26 + $0x40] sm:$0xff] %v2460_v27  ;;  %v2253_v41 = vadd.f32 %v2186_v5, %v2097_v32  ;;  %v2130_v28 = vshll.u32 %v4215_v58, 16  ;;  %v2134_v21 = vshrl.u32 %v4215_v58, 16  ;;  %v1965_v7 = vadd.f32 %v1901_v60, %v3968_v49 }
 0x248   : > { %v2126_v32 = vrot.slane %v2124_v51, 5  ;;  %v1853_v60 = vsel %vm3542_vm7, %v1851_v45, %v1852_v10 }
 0x249   : > { %v2393_v9 = vadd.f32 %v2326_v25, %v2253_v41  ;;  %v2033_v35 = vpop.f32.mrf.mxu2  ;;  %v2132_v27 = vrot.slane %v2130_v28, 5  ;;  %v2136_v25 = vrot.slane %v2134_v21, 4  ;;  %v2279_v28 = vrot.slane %v4215_v58, 5 }
 0x24a   : > { %v2098_v38 = vadd.f32 %v2033_v35, %v1964_v37  ;;  %v1857_v37 = vunpack.c.l.b16 %v1853_v60 }
 0x24b   : > { %v2429_v17 = vadd.f32 %v4135_v42, %v2393_v9  ;;  %2901 = vmatmul.msk.bf16.gmra.mxu3 %vm841_vm4, %v3551_v53  ;;  %v2121_v53 = vshrl.u32 %v4212_v3, 16  ;;  %v2281_v58 = vrot.slane %v2279_v28, 4 }
 0x24d   : > { %v2461_v55 = vmul.f32 0.23570226, %v2429_v17  ;;  %v2329_v33 = vpop.f32.mrf.mxu0  ;;  %v2123_v57 = vrot.slane %v2121_v53, 4  ;;  %v2137_v17 = vor.u32 %v2136_v25, %v2132_v27 }
 0x24e   : > { %v2189_v40 = vpop.f32.mrf.mxu3  ;;  %v1904_v50 = vpop.f32.mrf.mxu1 }
 0x24f   : > { %2493 = vst [vmem:[%s4147_s26 + $0x48] sm:$0xff] %v2461_v55  ;;  %v2254_v19 = vadd.f32 %v2189_v40, %v2098_v38  ;;  %v2127_v35 = vor.u32 %v2126_v32, %v2123_v57  ;;  %v1966_v44 = vadd.f32 %v1904_v50, %v3985_v54  ;;  %v2138_v48 = vrot.slane %v2137_v17, 4 }
 0x250   : > { %2919 = vmatmul.msk.bf16.gmra.mxu0 %vm841_vm4, %v3987_v46 }
 0x251   : > { %v2394_v4 = vadd.f32 %v2329_v33, %v2254_v19  ;;  %v2035_v62 = vpop.f32.mrf.mxu2  ;;  %2864 = vmatmul.msk.bf16.gmra.mxu1 %vm841_vm4, %v3987_v46  ;;  %v402_v46 = vld [vmem:[%s3938_s21 + $0x14] sm:$0x1]  ;;  %v2128_v19 = vrot.slane %v2127_v35, 4 }
 0x252   : > { %v2099_v1 = vadd.f32 %v2035_v62, %v1965_v7  ;;  %v2140_v38 = vshll.u32 %v402_v46, 16  ;;  %v2904_v7 = vrot.slane %v4212_v3, 9 }
 0x253   : > { %v2430_v2 = vadd.f32 %v4135_v42, %v2394_v4  ;;  %v2133_v50 = vsel %vm3239_vm3, %v2128_v19, %v2132_v27 }
 0x254   : > { %v2142_v6 = vrot.slane %v2140_v38, 5  ;;  %v2146_v32 = vunpack.c.l.b16 %v2133_v50  ;;  %v2280_v3 = vsel %vm3542_vm7, %v2904_v7, %v2279_v28 }
 0x255   : > { %v2462_v5 = vmul.f32 0.23570226, %v2430_v2  ;;  %v2331_v49 = vpop.f32.mrf.mxu0  ;;  %v2282_v2 = vrot.slane %v402_v46, 5 }
 0x256   : > { %v2191_v41 = vpop.f32.mrf.mxu3  ;;  %2885 = vmatmul.msk.bf16.gmra.mxu2 %vm841_vm4, %v3996_v22  ;;  %v1906_v47 = vpop.f32.mrf.mxu1  ;;  %v1858_v22 = vpack.c.b16 %v1857_v37, %v1856_v43 }
 0x257   : > { %2494 = vst [vmem:[%s4147_s26 + $0x50] sm:$0xff] %v2462_v5  ;;  %v2255_v9 = vadd.f32 %v2191_v41, %v2099_v1  ;;  %v1967_v45 = vadd.f32 %v1906_v47, %v3999_v61  ;;  %v2946_v1 = vld [vmem:[%s3938_s21 + $0xc] sm:$0xff]  ;;  %v2283_v61 = vsel %vm3542_vm7, %v2281_v58, %v2282_v2  ;;  %v2286_v41 = vunpack.c.l.b16 %v2280_v3  ;;  %s3040_s21 = scalar_lea.hbm %s4361_s4, 512 }
 0x258   : > { %v2287_v47 = vunpack.c.l.b16 %v2283_v61  ;;  %p3042_p2 = scmp.lt.s32.totalorder %s3040_s21, %s3036_s11 }
 0x259   : > { %v2395_v13 = vadd.f32 %v2331_v49, %v2255_v9  ;;  %v2038_v55 = vpop.f32.mrf.mxu2 }
 0x25a   : > { %v2100_v40 = vadd.f32 %v2038_v55, %v1966_v44  ;;  %v2288_v17 = vpack.c.b16 %v2287_v47, %v2286_v41  ;;  %p3043_p3 = por %p3042_p2, %p3041_p1 }
 0x25b   : > { %v2431_v33 = vadd.f32 %v4135_v42, %v2395_v13  ;;  %2902 = vmatmul.msk.bf16.gmra.mxu3 %vm841_vm4, %v4003_v31  ;;  %v2143_v31 = vsel %vm3239_vm3, %v2138_v48, %v2142_v6 }
 0x25c   : > { %v2147_v27 = vunpack.c.l.b16 %v2143_v31  ;;  %p3044_p5 = pnand %p3043_p3, %p3039_p0 }
 0x25d   : > { %v2463_v53 = vmul.f32 0.23570226, %v2431_v33  ;;  %v2334_v51 = vpop.f32.mrf.mxu0 }
 0x25e   : > { %v2194_v21 = vpop.f32.mrf.mxu3  ;;  %v1909_v4 = vpop.f32.mrf.mxu1  ;;  %v2148_v46 = vpack.c.b16 %v2147_v27, %v2146_v32 }
 0x25f   : > { %2495 = vst [vmem:[%s4147_s26 + $0x58] sm:$0xff] %v2463_v53  ;;  %v2256_v54 = vadd.f32 %v2194_v21, %v2100_v40  ;;  %v1968_v43 = vadd.f32 %v1909_v4, %v4010_v11 }
 0x260   : > { %2920 = vmatmul.msk.bf16.gmra.mxu0 %vm841_vm4, %v1858_v22 }
 0x261   : > { %v2396_v62 = vadd.f32 %v2334_v51, %v2256_v54  ;;  %v2040_v10 = vpop.f32.mrf.mxu2  ;;  %2865 = vmatmul.msk.bf16.gmra.mxu1 %vm841_vm4, %v1858_v22 }
 0x262   : > { %v2101_v57 = vadd.f32 %v2040_v10, %v1967_v45 }
 0x263   : > { %v2432_v12 = vadd.f32 %v4135_v42, %v2396_v62 }
 0x265   : > { %v2464_v25 = vmul.f32 0.23570226, %v2432_v12  ;;  %v2336_v36 = vpop.f32.mrf.mxu0 }
 0x266   : > { %v2196_v5 = vpop.f32.mrf.mxu3  ;;  %2886 = vmatmul.msk.bf16.gmra.mxu2 %vm841_vm4, %v2946_v1  ;;  %v1911_v49 = vpop.f32.mrf.mxu1 }
 0x267   : > { %2496 = vst [vmem:[%s4147_s26 + $0x60] sm:$0xff] %v2464_v25  ;;  %v2257_v60 = vadd.f32 %v2196_v5, %v2101_v57  ;;  %v1969_v22 = vadd.f32 %v1911_v49, %v4015_v30 }
 0x269   : > { %v2397_v9 = vadd.f32 %v2336_v36, %v2257_v60  ;;  %v2043_v37 = vpop.f32.mrf.mxu2 }
 0x26a   : > { %v2102_v14 = vadd.f32 %v2043_v37, %v1968_v43 }
 0x26b   : > { %v2433_v35 = vadd.f32 %v4135_v42, %v2397_v9  ;;  %2903 = vmatmul.msk.bf16.gmra.mxu3 %vm841_vm4, %v2148_v46 }
 0x26d   : > { %v2465_v38 = vmul.f32 0.23570226, %v2433_v35  ;;  %v2339_v13 = vpop.f32.mrf.mxu0 }
 0x26e   : > { %v2199_v44 = vpop.f32.mrf.mxu3  ;;  %v1914_v55 = vpop.f32.mrf.mxu1 }
 0x26f   : > { %2497 = vst [vmem:[%s4147_s26 + $0x68] sm:$0xff] %v2465_v38  ;;  %v2258_v33 = vadd.f32 %v2199_v44, %v2102_v14  ;;  %v1970_v54 = vadd.f32 %v1914_v55, %v4024_v16 }
 0x270   : > { %2921 = vmatmul.msk.bf16.gmra.mxu0 %vm841_vm4, %v2288_v17 }
 0x271   : > { %v2398_v40 = vadd.f32 %v2339_v13, %v2258_v33  ;;  %v2045_v11 = vpop.f32.mrf.mxu2 }
 0x272   : > { %v2103_v48 = vadd.f32 %v2045_v11, %v1969_v22 }
 0x273   : > { %v2434_v19 = vadd.f32 %v4135_v42, %v2398_v40 }
 0x275   : > { %v2466_v6 = vmul.f32 0.23570226, %v2434_v19  ;;  %v2341_v53 = vpop.f32.mrf.mxu0 }
 0x276   : > { %v2201_v51 = vpop.f32.mrf.mxu3  ;;  %v1916_v28 = vpop.f32.mrf.mxu1 }
 0x277   : > { %2498 = vst [vmem:[%s4147_s26 + $0x70] sm:$0xff] %v2466_v6  ;;  %v2259_v21 = vadd.f32 %v2201_v51, %v2103_v48  ;;  %v1971_v1 = vadd.f32 %v1916_v28, %v4029_v26 }
 0x279   : > { %v2399_v4 = vadd.f32 %v2341_v53, %v2259_v21  ;;  %v2048_v50 = vpop.f32.mrf.mxu2 }
 0x27a   : > { %v2104_v7 = vadd.f32 %v2048_v50, %v1970_v54 }
 0x27b   : > { %v2435_v31 = vadd.f32 %v4135_v42, %v2399_v4 }
 0x27d   : > { %v2467_v30 = vmul.f32 0.23570226, %v2435_v31  ;;  %v2344_v62 = vpop.f32.mrf.mxu0 }
 0x27e   : > { %v2204_v45 = vpop.f32.mrf.mxu3  ;;  %v1919_v10 = vpop.f32.mrf.mxu1 }
 0x27f   : > { %2499 = vst [vmem:[%s4147_s26 + $0x78] sm:$0xff] %v2467_v30  ;;  %v2260_v58 = vadd.f32 %v2204_v45, %v2104_v7  ;;  %v1972_v5 = vadd.f32 %v1919_v10, %v4038_v59 }
 0x281   : > { %v2400_v2 = vadd.f32 %v2344_v62, %v2260_v58  ;;  %v2050_v12 = vpop.f32.mrf.mxu2 }
 0x282   : > { %v2105_v32 = vadd.f32 %v2050_v12, %v1971_v1 }
 0x283   : > { %v2436_v57 = vadd.f32 %v4135_v42, %v2400_v2 }
 0x285   : > { %v2468_v16 = vmul.f32 0.23570226, %v2436_v57  ;;  %v2346_v27 = vpop.f32.mrf.mxu0 }
 0x286   : > { %v2206_v25 = vpop.f32.mrf.mxu3  ;;  %v1921_v36 = vpop.f32.mrf.mxu1 }
 0x287   : > { %2500 = vst [vmem:[%s4147_s26 + $0x80] sm:$0xff] %v2468_v16  ;;  %v2261_v3 = vadd.f32 %v2206_v25, %v2105_v32  ;;  %v1973_v35 = vadd.f32 %v1921_v36, %v4043_v39 }
 0x289   : > { %v2401_v61 = vadd.f32 %v2346_v27, %v2261_v3  ;;  %v2053_v49 = vpop.f32.mrf.mxu2 }
 0x28a   : > { %v2106_v46 = vadd.f32 %v2053_v49, %v1972_v5 }
 0x28b   : > { %v2437_v60 = vadd.f32 %v4135_v42, %v2401_v61 }
 0x28d   : > { %v2469_v26 = vmul.f32 0.23570226, %v2437_v60  ;;  %v2349_v41 = vpop.f32.mrf.mxu0 }
 0x28e   : > { %v2209_v47 = vpop.f32.mrf.mxu3  ;;  %v1924_v9 = vpop.f32.mrf.mxu1 }
 0x28f   : > { %2501 = vst [vmem:[%s4147_s26 + $0x88] sm:$0xff] %v2469_v26  ;;  %v2262_v43 = vadd.f32 %v2209_v47, %v2106_v46  ;;  %v1974_v22 = vadd.f32 %v1924_v9, %v4052_v23 }
 0x291   : > { %v2402_v37 = vadd.f32 %v2349_v41, %v2262_v43  ;;  %v2055_v14 = vpop.f32.mrf.mxu2 }
 0x292   : > { %v2107_v38 = vadd.f32 %v2055_v14, %v1973_v35 }
 0x293   : > { %v2438_v17 = vadd.f32 %v4135_v42, %v2402_v37 }
 0x295   : > { %v2470_v59 = vmul.f32 0.23570226, %v2438_v17  ;;  %v2351_v13 = vpop.f32.mrf.mxu0 }
 0x296   : > { %v2211_v44 = vpop.f32.mrf.mxu3  ;;  %v1926_v55 = vpop.f32.mrf.mxu1 }
 0x297   : > { %2502 = vst [vmem:[%s4147_s26 + $0x90] sm:$0xff] %v2470_v59  ;;  %v2263_v33 = vadd.f32 %v2211_v44, %v2107_v38  ;;  %v1975_v4 = vadd.f32 %v1926_v55, %v4057_v15 }
 0x299   : > { %v2403_v40 = vadd.f32 %v2351_v13, %v2263_v33  ;;  %v2058_v11 = vpop.f32.mrf.mxu2 }
 0x29a   : > { %v2108_v48 = vadd.f32 %v2058_v11, %v1974_v22 }
 0x29b   : > { %v2439_v19 = vadd.f32 %v4135_v42, %v2403_v40 }
 0x29d   : > { %v2471_v39 = vmul.f32 0.23570226, %v2439_v19  ;;  %v2354_v6 = vpop.f32.mrf.mxu0 }
 0x29e   : > { %v2214_v53 = vpop.f32.mrf.mxu3  ;;  %v1929_v51 = vpop.f32.mrf.mxu1 }
 0x29f   : > { %2503 = vst [vmem:[%s4147_s26 + $0x98] sm:$0xff] %v2471_v39  ;;  %v2264_v28 = vadd.f32 %v2214_v53, %v2108_v48  ;;  %v1976_v58 = vadd.f32 %v1929_v51, %v4066_v56 }
 0x2a1   : > { %v2404_v21 = vadd.f32 %v2354_v6, %v2264_v28  ;;  %v2060_v54 = vpop.f32.mrf.mxu2 }
 0x2a2   : > { %v2109_v31 = vadd.f32 %v2060_v54, %v1975_v4 }
 0x2a3   : > { %v2440_v50 = vadd.f32 %v4135_v42, %v2404_v21 }
 0x2a5   : > { %v2472_v23 = vmul.f32 0.23570226, %v2440_v50  ;;  %v2356_v7 = vpop.f32.mrf.mxu0 }
 0x2a6   : > { %v2216_v30 = vpop.f32.mrf.mxu3  ;;  %v1931_v62 = vpop.f32.mrf.mxu1 }
 0x2a7   : > { %2504 = vst [vmem:[%s4147_s26 + $0xa0] sm:$0xff] %v2472_v23  ;;  %v2265_v45 = vadd.f32 %v2216_v30, %v2109_v31  ;;  %v1977_v36 = vadd.f32 %v1931_v62, %v4071_v0 }
 0x2a9   : > { %v2405_v10 = vadd.f32 %v2356_v7, %v2265_v45  ;;  %v2063_v2 = vpop.f32.mrf.mxu2 }
 0x2aa   : > { %v2110_v12 = vadd.f32 %v2063_v2, %v1976_v58 }
 0x2ab   : > { %v2441_v1 = vadd.f32 %v4135_v42, %v2405_v10 }
 0x2ad   : > { %v2473_v15 = vmul.f32 0.23570226, %v2441_v1  ;;  %v2359_v57 = vpop.f32.mrf.mxu0 }
 0x2ae   : > { %v2219_v32 = vpop.f32.mrf.mxu3  ;;  %v1934_v16 = vpop.f32.mrf.mxu1 }
 0x2af   : > { %2505 = vst [vmem:[%s4147_s26 + $0xa8] sm:$0xff] %v2473_v15  ;;  %v2266_v27 = vadd.f32 %v2219_v32, %v2110_v12  ;;  %v1978_v47 = vadd.f32 %v1934_v16, %v4080_v29 }
 0x2b1   : > { %v2406_v25 = vadd.f32 %v2359_v57, %v2266_v27  ;;  %v2065_v3 = vpop.f32.mrf.mxu2 }
 0x2b2   : > { %v2111_v5 = vadd.f32 %v2065_v3, %v1977_v36 }
 0x2b3   : > { %v2442_v61 = vadd.f32 %v4135_v42, %v2406_v25 }
 0x2b5   : > { %v2474_v56 = vmul.f32 0.23570226, %v2442_v61  ;;  %v2361_v49 = vpop.f32.mrf.mxu0 }
 0x2b6   : > { %v2221_v60 = vpop.f32.mrf.mxu3  ;;  %v1936_v46 = vpop.f32.mrf.mxu1 }
 0x2b7   : > { %2506 = vst [vmem:[%s4147_s26 + $0xb0] sm:$0xff] %v2474_v56  ;;  %v2267_v26 = vadd.f32 %v2221_v60, %v2111_v5  ;;  %v1979_v13 = vadd.f32 %v1936_v46, %v4085_v52 }
 0x2b9   : > { %v2407_v41 = vadd.f32 %v2361_v49, %v2267_v26  ;;  %v2068_v9 = vpop.f32.mrf.mxu2 }
 0x2ba   : > { %v2112_v37 = vadd.f32 %v2068_v9, %v1978_v47 }
 0x2bb   : > { %v2443_v43 = vadd.f32 %v4135_v42, %v2407_v41 }
 0x2bd   : > { %v2475_v0 = vmul.f32 0.23570226, %v2443_v43  ;;  %v2364_v35 = vpop.f32.mrf.mxu0 }
 0x2be   : > { %v2224_v14 = vpop.f32.mrf.mxu3  ;;  %v1939_v17 = vpop.f32.mrf.mxu1 }
 0x2bf   : > { %2507 = vst [vmem:[%s4147_s26 + $0xb8] sm:$0xff] %v2475_v0  ;;  %v2268_v38 = vadd.f32 %v2224_v14, %v2112_v37  ;;  %v1980_v39 = vadd.f32 %v1939_v17, %v4094_v20 }
 0x2c1   : > { %v2408_v59 = vadd.f32 %v2364_v35, %v2268_v38  ;;  %v2070_v44 = vpop.f32.mrf.mxu2 }
 0x2c2   : > { %v2113_v33 = vadd.f32 %v2070_v44, %v1979_v13 }
 0x2c3   : > { %v2444_v55 = vadd.f32 %v4135_v42, %v2408_v59 }
 0x2c5   : > { %v2476_v29 = vmul.f32 0.23570226, %v2444_v55  ;;  %v2366_v40 = vpop.f32.mrf.mxu0 }
 0x2c6   : > { %v2226_v22 = vpop.f32.mrf.mxu3  ;;  %v1941_v11 = vpop.f32.mrf.mxu1 }
 0x2c7   : > { %2508 = vst [vmem:[%s4147_s26 + $0xc0] sm:$0xff] %v2476_v29  ;;  %v2269_v19 = vadd.f32 %v2226_v22, %v2113_v33  ;;  %v1981_v31 = vadd.f32 %v1941_v11, %v4099_v8 }
 0x2c9   : > { %v2409_v48 = vadd.f32 %v2366_v40, %v2269_v19  ;;  %v2073_v6 = vpop.f32.mrf.mxu2 }
 0x2ca   : > { %v2114_v51 = vadd.f32 %v2073_v6, %v1980_v39 }
 0x2cb   : > { %v2445_v53 = vadd.f32 %v4135_v42, %v2409_v48 }
 0x2cd   : > { %v2477_v52 = vmul.f32 0.23570226, %v2445_v53  ;;  %v2369_v28 = vpop.f32.mrf.mxu0 }
 0x2ce   : > { %v2229_v21 = vpop.f32.mrf.mxu3  ;;  %v1944_v54 = vpop.f32.mrf.mxu1 }
 0x2cf   : > { %2509 = vst [vmem:[%s4147_s26 + $0xc8] sm:$0xff] %v2477_v52  ;;  %v2270_v4 = vadd.f32 %v2229_v21, %v2114_v51  ;;  %v1982_v2 = vadd.f32 %v1944_v54, %v4108_v18 }
 0x2d1   : > { %v2410_v50 = vadd.f32 %v2369_v28, %v2270_v4  ;;  %v2075_v23 = vpop.f32.mrf.mxu2 }
 0x2d2   : > { %v2115_v30 = vadd.f32 %v2075_v23, %v1981_v31 }
 0x2d3   : > { %v2446_v7 = vadd.f32 %v4135_v42, %v2410_v50 }
 0x2d5   : > { %v2478_v20 = vmul.f32 0.23570226, %v2446_v7  ;;  %v2371_v62 = vpop.f32.mrf.mxu0 }
 0x2d6   : > { %v2231_v45 = vpop.f32.mrf.mxu3  ;;  %v1946_v12 = vpop.f32.mrf.mxu1 }
 0x2d7   : > { %2510 = vst [vmem:[%s4147_s26 + $0xd0] sm:$0xff] %v2478_v20  ;;  %v2271_v10 = vadd.f32 %v2231_v45, %v2115_v30  ;;  %v1983_v36 = vadd.f32 %v1946_v12, %v4113_v63 }
 0x2d9   : > { %v2411_v58 = vadd.f32 %v2371_v62, %v2271_v10  ;;  %v2078_v1 = vpop.f32.mrf.mxu2 }
 0x2da   : > { %v2116_v57 = vadd.f32 %v2078_v1, %v1982_v2 }
 0x2db   : > { %v2447_v15 = vadd.f32 %v4135_v42, %v2411_v58 }
 0x2dd   : > { %v2479_v8 = vmul.f32 0.23570226, %v2447_v15  ;;  %v2374_v32 = vpop.f32.mrf.mxu0 }
 0x2de   : > { %v2234_v16 = vpop.f32.mrf.mxu3  ;;  %v1949_v18 = vpop.f32.mrf.mxu1 }
 0x2df   : > { %2511 = vst [vmem:[%s4147_s26 + $0xd8] sm:$0xff] %v2479_v8  ;;  %v2272_v27 = vadd.f32 %v2234_v16, %v2116_v57  ;;  %v1984_v41 = vadd.f32 %v1949_v18, %v4122_v24 }
 0x2e1   : > { %v2412_v25 = vadd.f32 %v2374_v32, %v2272_v27  ;;  %v2080_v3 = vpop.f32.mrf.mxu2 }
 0x2e2   : > { %v2117_v5 = vadd.f32 %v2080_v3, %v1983_v36 }
 0x2e3   : > { %v2448_v61 = vadd.f32 %v4135_v42, %v2412_v25 }
 0x2e5   : > { %v2480_v56 = vmul.f32 0.23570226, %v2448_v61  ;;  %v2376_v49 = vpop.f32.mrf.mxu0 }
 0x2e6   : > { %v2236_v60 = vpop.f32.mrf.mxu3  ;;  %v1951_v37 = vpop.f32.mrf.mxu1 }
 0x2e7   : > { %2512 = vst [vmem:[%s4147_s26 + $0xe0] sm:$0xff] %v2480_v56  ;;  %v2273_v46 = vadd.f32 %v2236_v60, %v2117_v5  ;;  %v1985_v38 = vadd.f32 %v1951_v37, %v4127_v34 }
 0x2e9   : > { %v2413_v26 = vadd.f32 %v2376_v49, %v2273_v46  ;;  %v2083_v47 = vpop.f32.mrf.mxu2 }
 0x2ea   : > { %v2118_v43 = vadd.f32 %v2083_v47, %v1984_v41 }
 0x2eb   : > { %v2449_v9 = vadd.f32 %v4135_v42, %v2413_v26 }
 0x2ed   : > { %v2481_v63 = vmul.f32 0.23570226, %v2449_v9  ;;  %v2379_v0 = vpop.f32.mrf.mxu0 }
 0x2ee   : > { %v2239_v35 = vpop.f32.mrf.mxu3 }
 0x2ef   : > { %2513 = vst [vmem:[%s4147_s26 + $0xe8] sm:$0xff] %v2481_v63  ;;  %v2274_v14 = vadd.f32 %v2239_v35, %v2118_v43 }
 0x2f1   : > { %v2414_v17 = vadd.f32 %v2379_v0, %v2274_v14  ;;  %v2085_v59 = vpop.f32.mrf.mxu2 }
 0x2f2   : > { %v2119_v24 = vadd.f32 %v2085_v59, %v1985_v38 }
 0x2f3   : > { %v2450_v13 = vadd.f32 %v4135_v42, %v2414_v17 }
 0x2f5   : > { %v2482_v44 = vmul.f32 0.23570226, %v2450_v13  ;;  %v2381_v29 = vpop.f32.mrf.mxu0 }
 0x2f6   : > { %v2241_v55 = vpop.f32.mrf.mxu3 }
 0x2f7   : > { %2514 = vst [vmem:[%s4147_s26 + $0xf0] sm:$0xff] %v2482_v44  ;;  %v2275_v33 = vadd.f32 %v2241_v55, %v2119_v24 }
 0x2f9   : > { %v2415_v40 = vadd.f32 %v2381_v29, %v2275_v33 }
 0x2fb   : > { %v2451_v34 = vadd.f32 %v4135_v42, %v2415_v40 }
 0x2fd   : > { %v2483_v22 = vmul.f32 0.23570226, %v2451_v34 }
 0x2ff   : > { %2515 = vst [vmem:[%s4147_s26 + $0xf8] sm:$0xff] %v2483_v22 }
 0x300   : > { %3047 = shalt.err (!%p3044_p5)
}
 0x301   : > { %s3100_s7 = smov 128   ;;  %s3101_s24 = smov 8  }
 0x302   : > { %2953 = dma.vmem_to_hbm [thread:$0]  (%p3167_p4), %s2534_s8, 4096, %s2536_s9, %s2517_s18, %s3100_s7, %s3100_s7, %s3101_s24  }
 0x303 PF: > { %p2960_p6 = scmp.ge.s32.totalorder %s3098_s20, 2  ;;  %s2550_s26 = sand.u32 1, %s3078_s15  }
 0x304   : > { %s2551_s29 = scalar_lea.sflag [#allocation3], %s2550_s26 }
 0x305   : > { %p2956_p7 = pnand %p2960_p6, %p3174_p8 }
 0x307   : > { %p2957_p9 = pneg %p2956_p7 }
 0x309   : > { %3073 = dma.done.wait (%p2957_p9), %s2551_s29, 4096  }
 0x30a   : > { %3075 = vsyncadd (%p2957_p9), %s2551_s29, 4294963200  ;;  %s17_s20 = sadd.s32 1, %s3098_s20   ;;  %s4502_s15 = smov %s3082_s16 }
 0x30b   : > { %p14_p10 = scmp.ge.s32.totalorder %s17_s20, 4   ;;  %s4503_s16 = smov %s3086_s17 }
 0x30c   : > { %s4504_s17 = smov %s3180_s28  ;;  %s4505_s18 = smov %s3094_s19 }
 0x30d   : > { %s4506_s19 = smov %s4508_s23  ;;  %16 = sbr.rel (!%p14_p10) target bundleno = 4 (0x4), region = 88 }
 0x312   :  { %2557 = vsyncpa [#allocation3], 1 }
 0x313   :  { %2559 = vsyncpa [#allocation3 + $0x1], 1 }

</bundles_post_ra>
